<compile_context>
chip_gen: v6e
topology: v6e:2x2x1
jax: 0.10.0
libtpu: 0.0.40
codegen_flags: <defaults>
</compile_context>

<pallas_src>
import math

import jax
import jax.numpy as jnp
from jax import lax
from jax.experimental import pallas as pl
from jax.experimental.pallas import tpu as pltpu

PATCH_SIZE = 16
LANE = 128


def rearrange_patches(img, patch=PATCH_SIZE):
    # einops: 'b c (patch_x x) (patch_y y) -> b (x y) (patch_x patch_y c)'
    b, c, hh, ww = img.shape
    x, y = hh // patch, ww // patch
    t = img.reshape(b, c, patch, x, patch, y)          # (b, c, patch_x, x, patch_y, y)
    t = jnp.transpose(t, (0, 3, 5, 2, 4, 1))           # (b, x, y, patch_x, patch_y, c)
    return t.reshape(b, x * y, patch * patch * c)


def make_kernel(nb_heads, hidden):
    H = hidden
    hd = H // nb_heads
    scale = 1.0 / math.sqrt(hd)
    f32 = jnp.float32
    bf16 = jnp.bfloat16

    def kernel(xp_ref, wcat_ref, bcat_ref, wqkv_ref, bqkv_ref,
               wo_ref, bo_ref, g1_ref, be1_ref,
               w1_ref, b1_ref, w2_ref, b2_ref, g2_ref, be2_ref,
               wh_ref, bh_ref, out_ref):
        B0 = xp_ref.shape[0]

        def mm(a, w_ref, b_ref):
            # bf16 MXU inputs, f32 accumulation, f32 bias add.
            return (jnp.dot(a.astype(bf16), w_ref[...],
                            preferred_element_type=f32) + b_ref[...])

        def layer_norm(v, g_ref, b_ref):
            mu = jnp.mean(v, axis=-1, keepdims=True)
            var = jnp.mean(jnp.square(v - mu), axis=-1, keepdims=True)
            return (v - mu) * lax.rsqrt(var + 1e-5) * g_ref[...] + b_ref[...]

        # LLcat on the cls-token rows only: xp = [cls_token | pos] of shape (B0, 2H).
        h_cat = mm(xp_ref[...], wcat_ref, bcat_ref)              # (B0, H), f32

        # Fused Q/K/V projection: one (B0, H) x (H, 3H) matmul.
        qkv = mm(h_cat, wqkv_ref, bqkv_ref)                      # (B0, 3H)
        q, k, v = qkv[:, :H], qkv[:, H:2 * H], qkv[:, 2 * H:]

        def heads(m):                                            # (B0, H) -> (heads, B0, hd)
            return jnp.transpose(m.reshape(B0, nb_heads, hd), (1, 0, 2))

        qh = heads(q).astype(bf16)
        kh = heads(k).astype(bf16)
        vh = heads(v).astype(bf16)

        # Attention over the image batch (dim 0 of the MHA input) at token position 0,
        # batched over heads in a single dot_general.
        s = lax.dot_general(qh, kh, (((2,), (2,)), ((0,), (0,))),
                            preferred_element_type=f32) * scale  # (heads, B0, B0)
        s = s - jnp.max(s, axis=-1, keepdims=True)
        p = jnp.exp(s)
        p = p * pl.reciprocal(jnp.sum(p, axis=-1, keepdims=True), approx=True)
        ctx = lax.dot_general(p.astype(bf16), vh, (((2,), (1,)), ((0,), (0,))),
                              preferred_element_type=f32)        # (heads, B0, hd)
        attn = jnp.transpose(ctx, (1, 0, 2)).reshape(B0, H)      # (B0, H)

        # Out-proj, residual + LN1, MLP, residual + LN2, classification head.
        mha = mm(attn, wo_ref, bo_ref)
        h1 = layer_norm(h_cat + mha, g1_ref, be1_ref)
        mlp = mm(jnp.maximum(mm(h1, w1_ref, b1_ref), 0.0), w2_ref, b2_ref)
        h2 = layer_norm(h1 + mlp, g2_ref, be2_ref)
        out_ref[...] = mm(h2, wh_ref, bh_ref).astype(out_ref.dtype)

    return kernel


def multilabel_ann_forward(img, pos, params, nb_heads, no_classes):
    f32, bf16 = jnp.float32, jnp.bfloat16
    hidden = params["cls_token"].shape[-1]
    B0 = img.shape[0]
    H = hidden

    # NOTE: the image patches never reach the output (see header comment) — this is
    # exact, not an approximation; only the cls row (== cls_token broadcast) and pos
    # enter the kernel.  The patchify glue is exercised by the pure-JAX reference.
    cls = jnp.broadcast_to(params["cls_token"].reshape(1, H), (B0, H)).astype(f32)
    xp = jnp.concatenate([cls, pos.astype(f32)], axis=-1)        # (B0, 2H)

    # Fused QKV weights; classification head padded to a lane-dense (x128) output.
    wqkv = jnp.concatenate([params["wq"], params["wk"], params["wv"]], axis=1)
    bqkv = jnp.concatenate([params["bq"], params["bk"], params["bv"]], axis=1)
    nc_pad = ((no_classes + LANE - 1) // LANE) * LANE
    wh_pad = jnp.pad(params["wh"], ((0, 0), (0, nc_pad - no_classes)))
    bh_pad = jnp.pad(params["bh"], ((0, 0), (0, nc_pad - no_classes)))

    operands = (
        xp,
        params["wcat"].astype(bf16), params["bcat"],
        wqkv.astype(bf16), bqkv,
        params["wo"].astype(bf16), params["bo"],
        params["ln1_g"], params["ln1_b"],
        params["w1"].astype(bf16), params["b1"],
        params["w2"].astype(bf16), params["b2"],
        params["ln2_g"], params["ln2_b"],
        wh_pad.astype(bf16), bh_pad,
    )

    out = pl.pallas_call(
        make_kernel(nb_heads, hidden),
        out_shape=jax.ShapeDtypeStruct((B0, nc_pad), f32),
        in_specs=[pl.BlockSpec(memory_space=pltpu.MemorySpace.VMEM)
                  for _ in operands],
        out_specs=pl.BlockSpec(memory_space=pltpu.MemorySpace.VMEM),
        # Explicit VMEM budget: weights are bf16 and everything else is (B0, H)-sized,
        # so a conservative limit fits comfortably on v5e/v6e/v7x.
        compiler_params=pltpu.CompilerParams(vmem_limit_bytes=32 * 1024 * 1024),
    )(*operands)
    return out[:, :no_classes]


def reference_forward(img, pos, params, nb_heads):
    # Pure-JAX reference mirroring the PyTorch module exactly (all tokens computed).
    P = lax.Precision.HIGHEST
    hidden = params["cls_token"].shape[-1]
    patches = rearrange_patches(img, PATCH_SIZE)
    b = img.shape[0]
    cls = jnp.broadcast_to(params["cls_token"], (b, 1, hidden)).astype(jnp.float32)
    g = jnp.concatenate([cls, patches], axis=1)                  # (B0, B1, H)
    B0, B1, H = g.shape
    hd = H // nb_heads
    posr = jnp.broadcast_to(pos[:, None, :], (B0, B1, H))
    hcat = jnp.dot(jnp.concatenate([g, posr], axis=-1), params["wcat"], precision=P) + params["bcat"]

    q = jnp.dot(hcat, params["wq"], precision=P) + params["bq"]
    k = jnp.dot(hcat, params["wk"], precision=P) + params["bk"]
    v = jnp.dot(hcat, params["wv"], precision=P) + params["bv"]
    qh = q.reshape(B0, B1, nb_heads, hd)
    kh = k.reshape(B0, B1, nb_heads, hd)
    vh = v.reshape(B0, B1, nb_heads, hd)
    s = jnp.einsum("lnhd,mnhd->nhlm", qh, kh, precision=P) / math.sqrt(hd)
    s = s - s.max(-1, keepdims=True)
    p = jnp.exp(s)
    p = p / p.sum(-1, keepdims=True)
    o = jnp.einsum("nhlm,mnhd->lnhd", p, vh, precision=P).reshape(B0, B1, H)
    mha = jnp.dot(o, params["wo"], precision=P) + params["bo"]

    def ln(x, g_, b_):
        mu = x.mean(-1, keepdims=True)
        var = ((x - mu) ** 2).mean(-1, keepdims=True)
        return (x - mu) / jnp.sqrt(var + 1e-5) * g_ + b_

    h1 = ln(hcat + mha, params["ln1_g"], params["ln1_b"])
    mlp = jnp.dot(jnp.maximum(jnp.dot(h1, params["w1"], precision=P) + params["b1"], 0.0),
                  params["w2"], precision=P) + params["b2"]
    h2 = ln(h1 + mlp, params["ln2_g"], params["ln2_b"])
    return jnp.dot(h2[:, 0, :], params["wh"], precision=P) + params["bh"]


def init_params(key, hidden, no_classes):
    ks = jax.random.split(key, 17)

    def w(k, shape, scale=0.02):
        return (scale * jax.random.normal(k, shape)).astype(jnp.float32)

    return {
        "cls_token": w(ks[0], (1, 1, hidden), 1.0),
        "wcat": w(ks[1], (2 * hidden, hidden)), "bcat": w(ks[2], (1, hidden)),
        "wq": w(ks[3], (hidden, hidden)), "bq": w(ks[4], (1, hidden)),
        "wk": w(ks[5], (hidden, hidden)), "bk": w(ks[6], (1, hidden)),
        "wv": w(ks[7], (hidden, hidden)), "bv": w(ks[8], (1, hidden)),
        "wo": w(ks[9], (hidden, hidden)), "bo": w(ks[10], (1, hidden)),
        "ln1_g": jnp.ones((1, hidden), jnp.float32), "ln1_b": jnp.zeros((1, hidden), jnp.float32),
        "w1": w(ks[11], (hidden, hidden)), "b1": w(ks[12], (1, hidden)),
        "w2": w(ks[13], (hidden, hidden)), "b2": w(ks[14], (1, hidden)),
        "ln2_g": jnp.ones((1, hidden), jnp.float32), "ln2_b": jnp.zeros((1, hidden), jnp.float32),
        "wh": w(ks[15], (hidden, no_classes)), "bh": w(ks[16], (1, no_classes)),
    }


if __name__ == "__main__":
    key = jax.random.PRNGKey(0)
    k_img, k_pos, k_par = jax.random.split(key, 3)

    bs, c, Himg, Wimg = 2, 1, 16, 16
    hidden = PATCH_SIZE * PATCH_SIZE * c       # patch embedding dim must equal hidden_size
    nb_heads, no_classes = 4, 10
    assert hidden % nb_heads == 0

    img = jax.random.normal(k_img, (bs, c, Himg, Wimg), jnp.float32)
    # pos matches g_seq.size(0) (the image batch dim) per the module's encoder usage
    pos = jax.random.normal(k_pos, (bs, hidden), jnp.float32)
    params = init_params(k_par, hidden, no_classes)

    out = multilabel_ann_forward(img, pos, params, nb_heads, no_classes)
    out = jax.block_until_ready(out)
    assert out.shape == (bs, no_classes)

    ref = reference_forward(img, pos, params, nb_heads)
    assert jnp.allclose(out, ref, rtol=2e-2, atol=1e-2), (out, ref)

    print("KERNEL_OK")
</pallas_src>

<mosaic_0001>
module attributes {stable_mosaic.version = 11 : i64} {
  func.func @kernel(%arg0: memref<2x512xf32, #tpu.memory_space<vmem>>, %arg1: memref<512x256xbf16, #tpu.memory_space<vmem>>, %arg2: memref<1x256xf32, #tpu.memory_space<vmem>>, %arg3: memref<256x768xbf16, #tpu.memory_space<vmem>>, %arg4: memref<1x768xf32, #tpu.memory_space<vmem>>, %arg5: memref<256x256xbf16, #tpu.memory_space<vmem>>, %arg6: memref<1x256xf32, #tpu.memory_space<vmem>>, %arg7: memref<1x256xf32, #tpu.memory_space<vmem>>, %arg8: memref<1x256xf32, #tpu.memory_space<vmem>>, %arg9: memref<256x256xbf16, #tpu.memory_space<vmem>>, %arg10: memref<1x256xf32, #tpu.memory_space<vmem>>, %arg11: memref<256x256xbf16, #tpu.memory_space<vmem>>, %arg12: memref<1x256xf32, #tpu.memory_space<vmem>>, %arg13: memref<1x256xf32, #tpu.memory_space<vmem>>, %arg14: memref<1x256xf32, #tpu.memory_space<vmem>>, %arg15: memref<256x128xbf16, #tpu.memory_space<vmem>>, %arg16: memref<1x128xf32, #tpu.memory_space<vmem>>, %arg17: memref<2x128xf32, #tpu.memory_space<vmem>>) attributes {dimension_semantics = [], scalar_prefetch = 0 : i64, scratch_operands = 0 : i64, tpu.core_type = #tpu.core_type<tc>} {
    %c0 = arith.constant 0 : index
    %c0_0 = arith.constant 0 : index
    %0 = vector.load %arg0[%c0, %c0_0] : memref<2x512xf32, #tpu.memory_space<vmem>>, vector<2x512xf32>
    %1 = arith.truncf %0 : vector<2x512xf32> to vector<2x512xbf16>
    %c0_1 = arith.constant 0 : index
    %c0_2 = arith.constant 0 : index
    %2 = vector.load %arg1[%c0_1, %c0_2] : memref<512x256xbf16, #tpu.memory_space<vmem>>, vector<512x256xbf16>
    %cst = arith.constant dense<0.000000e+00> : vector<2x256xf32>
    %3 = tpu.matmul %1, %2, %cst {dimension_numbers = #tpu.dot_dimension_numbers<[1], [0], [0], [1], [0, 0, 1, 1], [], []>} : vector<2x512xbf16>, vector<512x256xbf16>, vector<2x256xf32> -> vector<2x256xf32>
    %c0_3 = arith.constant 0 : index
    %c0_4 = arith.constant 0 : index
    %4 = vector.load %arg2[%c0_3, %c0_4] : memref<1x256xf32, #tpu.memory_space<vmem>>, vector<1x256xf32>
    %5 = vector.broadcast %4 : vector<1x256xf32> to vector<2x256xf32>
    %6 = arith.addf %3, %5 : vector<2x256xf32>
    %7 = arith.truncf %6 : vector<2x256xf32> to vector<2x256xbf16>
    %c0_5 = arith.constant 0 : index
    %c0_6 = arith.constant 0 : index
    %8 = vector.load %arg3[%c0_5, %c0_6] : memref<256x768xbf16, #tpu.memory_space<vmem>>, vector<256x768xbf16>
    %cst_7 = arith.constant dense<0.000000e+00> : vector<2x768xf32>
    %9 = tpu.matmul %7, %8, %cst_7 {dimension_numbers = #tpu.dot_dimension_numbers<[1], [0], [0], [1], [0, 0, 1, 1], [], []>} : vector<2x256xbf16>, vector<256x768xbf16>, vector<2x768xf32> -> vector<2x768xf32>
    %c0_8 = arith.constant 0 : index
    %c0_9 = arith.constant 0 : index
    %10 = vector.load %arg4[%c0_8, %c0_9] : memref<1x768xf32, #tpu.memory_space<vmem>>, vector<1x768xf32>
    %11 = vector.broadcast %10 : vector<1x768xf32> to vector<2x768xf32>
    %12 = arith.addf %9, %11 : vector<2x768xf32>
    %13 = vector.extract_strided_slice %12 {offsets = [0, 0], sizes = [2, 256], strides = [1, 1]} : vector<2x768xf32> to vector<2x256xf32>
    %14 = vector.extract_strided_slice %12 {offsets = [0, 256], sizes = [2, 256], strides = [1, 1]} : vector<2x768xf32> to vector<2x256xf32>
    %15 = vector.extract_strided_slice %12 {offsets = [0, 512], sizes = [2, 256], strides = [1, 1]} : vector<2x768xf32> to vector<2x256xf32>
    %16 = vector.shape_cast %13 : vector<2x256xf32> to vector<2x4x64xf32>
    %17 = tpu.transpose %16, [1, 0, 2] : vector<2x4x64xf32> -> vector<4x2x64xf32>
    %18 = arith.truncf %17 : vector<4x2x64xf32> to vector<4x2x64xbf16>
    %19 = vector.shape_cast %14 : vector<2x256xf32> to vector<2x4x64xf32>
    %20 = tpu.transpose %19, [1, 0, 2] : vector<2x4x64xf32> -> vector<4x2x64xf32>
    %21 = arith.truncf %20 : vector<4x2x64xf32> to vector<4x2x64xbf16>
    %22 = vector.shape_cast %15 : vector<2x256xf32> to vector<2x4x64xf32>
    %23 = tpu.transpose %22, [1, 0, 2] : vector<2x4x64xf32> -> vector<4x2x64xf32>
    %24 = arith.truncf %23 : vector<4x2x64xf32> to vector<4x2x64xbf16>
    %cst_10 = arith.constant dense<0.000000e+00> : vector<4x2x2xf32>
    %25 = tpu.matmul %18, %21, %cst_10 {dimension_numbers = #tpu.dot_dimension_numbers<[2], [2], [1], [1], [0, 0, 0, 1, 1, 1], [0], [0]>} : vector<4x2x64xbf16>, vector<4x2x64xbf16>, vector<4x2x2xf32> -> vector<4x2x2xf32>
    %cst_11 = arith.constant 1.250000e-01 : f32
    %26 = vector.broadcast %cst_11 : f32 to vector<4x2x2xf32>
    %27 = arith.mulf %25, %26 : vector<4x2x2xf32>
    %cst_12 = arith.constant dense<0xFF800000> : vector<4x2xf32>
    %28 = vector.multi_reduction <maximumf>, %27, %cst_12 [2] : vector<4x2x2xf32> to vector<4x2xf32>
    %29 = vector.shape_cast %28 : vector<4x2xf32> to vector<4x2x1xf32>
    %30 = vector.broadcast %29 : vector<4x2x1xf32> to vector<4x2x2xf32>
    %31 = arith.subf %27, %30 : vector<4x2x2xf32>
    %32 = math.exp %31 : vector<4x2x2xf32>
    %cst_13 = arith.constant dense<0.000000e+00> : vector<4x2xf32>
    %33 = vector.multi_reduction <add>, %32, %cst_13 [2] : vector<4x2x2xf32> to vector<4x2xf32>
    %34 = vector.shape_cast %33 : vector<4x2xf32> to vector<4x2x1xf32>
    %35 = tpu.reciprocal %34 {approx = true} : vector<4x2x1xf32> -> vector<4x2x1xf32>
    %36 = vector.broadcast %35 : vector<4x2x1xf32> to vector<4x2x2xf32>
    %37 = arith.mulf %32, %36 : vector<4x2x2xf32>
    %38 = arith.truncf %37 : vector<4x2x2xf32> to vector<4x2x2xbf16>
    %cst_14 = arith.constant dense<0.000000e+00> : vector<4x2x64xf32>
    %39 = tpu.matmul %38, %24, %cst_14 {dimension_numbers = #tpu.dot_dimension_numbers<[2], [1], [1], [2], [0, 0, 0, 1, 1, 2], [0], [0]>} : vector<4x2x2xbf16>, vector<4x2x64xbf16>, vector<4x2x64xf32> -> vector<4x2x64xf32>
    %40 = tpu.transpose %39, [1, 0, 2] : vector<4x2x64xf32> -> vector<2x4x64xf32>
    %41 = vector.shape_cast %40 : vector<2x4x64xf32> to vector<2x256xf32>
    %42 = arith.truncf %41 : vector<2x256xf32> to vector<2x256xbf16>
    %c0_15 = arith.constant 0 : index
    %c0_16 = arith.constant 0 : index
    %43 = vector.load %arg5[%c0_15, %c0_16] : memref<256x256xbf16, #tpu.memory_space<vmem>>, vector<256x256xbf16>
    %cst_17 = arith.constant dense<0.000000e+00> : vector<2x256xf32>
    %44 = tpu.matmul %42, %43, %cst_17 {dimension_numbers = #tpu.dot_dimension_numbers<[1], [0], [0], [1], [0, 0, 1, 1], [], []>} : vector<2x256xbf16>, vector<256x256xbf16>, vector<2x256xf32> -> vector<2x256xf32>
    %c0_18 = arith.constant 0 : index
    %c0_19 = arith.constant 0 : index
    %45 = vector.load %arg6[%c0_18, %c0_19] : memref<1x256xf32, #tpu.memory_space<vmem>>, vector<1x256xf32>
    %46 = vector.broadcast %45 : vector<1x256xf32> to vector<2x256xf32>
    %47 = arith.addf %44, %46 : vector<2x256xf32>
    %48 = arith.addf %6, %47 : vector<2x256xf32>
    %cst_20 = arith.constant dense<0.000000e+00> : vector<2xf32>
    %49 = vector.multi_reduction <add>, %48, %cst_20 [1] : vector<2x256xf32> to vector<2xf32>
    %50 = vector.shape_cast %49 : vector<2xf32> to vector<2x1xf32>
    %cst_21 = arith.constant 2.560000e+02 : f32
    %51 = vector.broadcast %cst_21 : f32 to vector<2x1xf32>
    %52 = arith.divf %50, %51 : vector<2x1xf32>
    %53 = vector.broadcast %52 : vector<2x1xf32> to vector<2x256xf32>
    %54 = arith.subf %48, %53 : vector<2x256xf32>
    %55 = arith.mulf %54, %54 : vector<2x256xf32>
    %cst_22 = arith.constant dense<0.000000e+00> : vector<2xf32>
    %56 = vector.multi_reduction <add>, %55, %cst_22 [1] : vector<2x256xf32> to vector<2xf32>
    %57 = vector.shape_cast %56 : vector<2xf32> to vector<2x1xf32>
    %cst_23 = arith.constant 2.560000e+02 : f32
    %58 = vector.broadcast %cst_23 : f32 to vector<2x1xf32>
    %59 = arith.divf %57, %58 : vector<2x1xf32>
    %60 = vector.broadcast %52 : vector<2x1xf32> to vector<2x256xf32>
    %61 = arith.subf %48, %60 : vector<2x256xf32>
    %cst_24 = arith.constant 9.99999974E-6 : f32
    %62 = vector.broadcast %cst_24 : f32 to vector<2x1xf32>
    %63 = arith.addf %59, %62 : vector<2x1xf32>
    %64 = math.rsqrt %63 : vector<2x1xf32>
    %65 = vector.broadcast %64 : vector<2x1xf32> to vector<2x256xf32>
    %66 = arith.mulf %61, %65 : vector<2x256xf32>
    %c0_25 = arith.constant 0 : index
    %c0_26 = arith.constant 0 : index
    %67 = vector.load %arg7[%c0_25, %c0_26] : memref<1x256xf32, #tpu.memory_space<vmem>>, vector<1x256xf32>
    %68 = vector.broadcast %67 : vector<1x256xf32> to vector<2x256xf32>
    %69 = arith.mulf %66, %68 : vector<2x256xf32>
    %c0_27 = arith.constant 0 : index
    %c0_28 = arith.constant 0 : index
    %70 = vector.load %arg8[%c0_27, %c0_28] : memref<1x256xf32, #tpu.memory_space<vmem>>, vector<1x256xf32>
    %71 = vector.broadcast %70 : vector<1x256xf32> to vector<2x256xf32>
    %72 = arith.addf %69, %71 : vector<2x256xf32>
    %73 = arith.truncf %72 : vector<2x256xf32> to vector<2x256xbf16>
    %c0_29 = arith.constant 0 : index
    %c0_30 = arith.constant 0 : index
    %74 = vector.load %arg9[%c0_29, %c0_30] : memref<256x256xbf16, #tpu.memory_space<vmem>>, vector<256x256xbf16>
    %cst_31 = arith.constant dense<0.000000e+00> : vector<2x256xf32>
    %75 = tpu.matmul %73, %74, %cst_31 {dimension_numbers = #tpu.dot_dimension_numbers<[1], [0], [0], [1], [0, 0, 1, 1], [], []>} : vector<2x256xbf16>, vector<256x256xbf16>, vector<2x256xf32> -> vector<2x256xf32>
    %c0_32 = arith.constant 0 : index
    %c0_33 = arith.constant 0 : index
    %76 = vector.load %arg10[%c0_32, %c0_33] : memref<1x256xf32, #tpu.memory_space<vmem>>, vector<1x256xf32>
    %77 = vector.broadcast %76 : vector<1x256xf32> to vector<2x256xf32>
    %78 = arith.addf %75, %77 : vector<2x256xf32>
    %cst_34 = arith.constant 0.000000e+00 : f32
    %79 = vector.broadcast %cst_34 : f32 to vector<2x256xf32>
    %80 = arith.maximumf %78, %79 : vector<2x256xf32>
    %81 = arith.truncf %80 : vector<2x256xf32> to vector<2x256xbf16>
    %c0_35 = arith.constant 0 : index
    %c0_36 = arith.constant 0 : index
    %82 = vector.load %arg11[%c0_35, %c0_36] : memref<256x256xbf16, #tpu.memory_space<vmem>>, vector<256x256xbf16>
    %cst_37 = arith.constant dense<0.000000e+00> : vector<2x256xf32>
    %83 = tpu.matmul %81, %82, %cst_37 {dimension_numbers = #tpu.dot_dimension_numbers<[1], [0], [0], [1], [0, 0, 1, 1], [], []>} : vector<2x256xbf16>, vector<256x256xbf16>, vector<2x256xf32> -> vector<2x256xf32>
    %c0_38 = arith.constant 0 : index
    %c0_39 = arith.constant 0 : index
    %84 = vector.load %arg12[%c0_38, %c0_39] : memref<1x256xf32, #tpu.memory_space<vmem>>, vector<1x256xf32>
    %85 = vector.broadcast %84 : vector<1x256xf32> to vector<2x256xf32>
    %86 = arith.addf %83, %85 : vector<2x256xf32>
    %87 = arith.addf %72, %86 : vector<2x256xf32>
    %cst_40 = arith.constant dense<0.000000e+00> : vector<2xf32>
    %88 = vector.multi_reduction <add>, %87, %cst_40 [1] : vector<2x256xf32> to vector<2xf32>
    %89 = vector.shape_cast %88 : vector<2xf32> to vector<2x1xf32>
    %cst_41 = arith.constant 2.560000e+02 : f32
    %90 = vector.broadcast %cst_41 : f32 to vector<2x1xf32>
    %91 = arith.divf %89, %90 : vector<2x1xf32>
    %92 = vector.broadcast %91 : vector<2x1xf32> to vector<2x256xf32>
    %93 = arith.subf %87, %92 : vector<2x256xf32>
    %94 = arith.mulf %93, %93 : vector<2x256xf32>
    %cst_42 = arith.constant dense<0.000000e+00> : vector<2xf32>
    %95 = vector.multi_reduction <add>, %94, %cst_42 [1] : vector<2x256xf32> to vector<2xf32>
    %96 = vector.shape_cast %95 : vector<2xf32> to vector<2x1xf32>
    %cst_43 = arith.constant 2.560000e+02 : f32
    %97 = vector.broadcast %cst_43 : f32 to vector<2x1xf32>
    %98 = arith.divf %96, %97 : vector<2x1xf32>
    %99 = vector.broadcast %91 : vector<2x1xf32> to vector<2x256xf32>
    %100 = arith.subf %87, %99 : vector<2x256xf32>
    %cst_44 = arith.constant 9.99999974E-6 : f32
    %101 = vector.broadcast %cst_44 : f32 to vector<2x1xf32>
    %102 = arith.addf %98, %101 : vector<2x1xf32>
    %103 = math.rsqrt %102 : vector<2x1xf32>
    %104 = vector.broadcast %103 : vector<2x1xf32> to vector<2x256xf32>
    %105 = arith.mulf %100, %104 : vector<2x256xf32>
    %c0_45 = arith.constant 0 : index
    %c0_46 = arith.constant 0 : index
    %106 = vector.load %arg13[%c0_45, %c0_46] : memref<1x256xf32, #tpu.memory_space<vmem>>, vector<1x256xf32>
    %107 = vector.broadcast %106 : vector<1x256xf32> to vector<2x256xf32>
    %108 = arith.mulf %105, %107 : vector<2x256xf32>
    %c0_47 = arith.constant 0 : index
    %c0_48 = arith.constant 0 : index
    %109 = vector.load %arg14[%c0_47, %c0_48] : memref<1x256xf32, #tpu.memory_space<vmem>>, vector<1x256xf32>
    %110 = vector.broadcast %109 : vector<1x256xf32> to vector<2x256xf32>
    %111 = arith.addf %108, %110 : vector<2x256xf32>
    %112 = arith.truncf %111 : vector<2x256xf32> to vector<2x256xbf16>
    %c0_49 = arith.constant 0 : index
    %c0_50 = arith.constant 0 : index
    %113 = vector.load %arg15[%c0_49, %c0_50] : memref<256x128xbf16, #tpu.memory_space<vmem>>, vector<256x128xbf16>
    %cst_51 = arith.constant dense<0.000000e+00> : vector<2x128xf32>
    %114 = tpu.matmul %112, %113, %cst_51 {dimension_numbers = #tpu.dot_dimension_numbers<[1], [0], [0], [1], [0, 0, 1, 1], [], []>} : vector<2x256xbf16>, vector<256x128xbf16>, vector<2x128xf32> -> vector<2x128xf32>
    %c0_52 = arith.constant 0 : index
    %c0_53 = arith.constant 0 : index
    %115 = vector.load %arg16[%c0_52, %c0_53] : memref<1x128xf32, #tpu.memory_space<vmem>>, vector<1x128xf32>
    %116 = vector.broadcast %115 : vector<1x128xf32> to vector<2x128xf32>
    %117 = arith.addf %114, %116 : vector<2x128xf32>
    %c0_54 = arith.constant 0 : index
    %c0_55 = arith.constant 0 : index
    %118 = vector.load %arg17[%c0_54, %c0_55] : memref<2x128xf32, #tpu.memory_space<vmem>>, vector<2x128xf32>
    tpu.vector_store %arg17[%c0_54, %c0_55], %117 {strides = array<i32>} : memref<2x128xf32, #tpu.memory_space<vmem>>, vector<2x128xf32>,
    return
  }
}

</mosaic_0001>

<bundles_post_ra>
// kernel: tpu_custom_call.1
= control target key start
LH: loop header
LB: loop body
LE: loop exit
PB: predicated region body
PF: predicated region fallthrough
CT: control target
= control target key end

     0   :  { %s4512_s0 = inlined_call_operand.hbm [shape: f32[2,512], index: 0, kind: input, shape index: {}]   ;;  %s4513_s1 = inlined_call_operand.hbm [shape: bf16[512,256], index: 1, kind: input, shape index: {}]   ;;  %s4514_s2 = inlined_call_operand.hbm [shape: f32[1,256], index: 2, kind: input, shape index: {}]   ;;  %s4515_s3 = inlined_call_operand.hbm [shape: bf16[256,768], index: 3, kind: input, shape index: {}]   ;;  %s4516_s4 = inlined_call_operand.vmem [shape: f32[1,768], index: 4, kind: input, shape index: {}]   ;;  %s4517_s5 = inlined_call_operand.hbm [shape: bf16[256,256], index: 5, kind: input, shape index: {}]   ;;  %s4518_s6 = inlined_call_operand.vmem [shape: f32[1,256], index: 6, kind: input, shape index: {}]   ;;  %s4519_s7 = inlined_call_operand.vmem [shape: f32[1,256], index: 7, kind: input, shape index: {}]   ;;  %s4520_s8 = inlined_call_operand.vmem [shape: f32[1,256], index: 8, kind: input, shape index: {}]   ;;  %s4521_s9 = inlined_call_operand.hbm [shape: bf16[256,256], index: 9, kind: input, shape index: {}]   ;;  %s4522_s10 = inlined_call_operand.vmem [shape: f32[1,256], index: 10, kind: input, shape index: {}]   ;;  %s4523_s11 = inlined_call_operand.hbm [shape: bf16[256,256], index: 11, kind: input, shape index: {}]   ;;  %s4524_s12 = inlined_call_operand.vmem [shape: f32[1,256], index: 12, kind: input, shape index: {}]   ;;  %s4525_s13 = inlined_call_operand.vmem [shape: f32[1,256], index: 13, kind: input, shape index: {}]   ;;  %s4526_s14 = inlined_call_operand.vmem [shape: f32[1,256], index: 14, kind: input, shape index: {}]   ;;  %s4527_s15 = inlined_call_operand.hbm [shape: bf16[256,128], index: 15, kind: input, shape index: {}]   ;;  %s4528_s16 = inlined_call_operand.vmem [shape: f32[1,128], index: 16, kind: input, shape index: {}]   ;;  %s4529_s17 = inlined_call_operand.hbm [shape: f32[2,128], index: 17, kind: output, shape index: {}]  }
   0x1   :  { %4530 = sst [smem:[#allocation23_spill]] %s4512_s0 }
   0x2   :  { %4531 = sst [smem:[#allocation24_spill]] %s4513_s1 }
   0x3   :  { %22 = vsyncpa [#allocation3], 0 }
   0x4   :  { %23 = vsyncpa [#allocation6], 0 }
   0x5   :  { %24 = vsyncpa [#allocation9], 0 }
   0x6   :  { %25 = vsyncpa [#allocation12], 0 }
   0x7   :  { %26 = vsyncpa [#allocation15], 0 }
   0x8   :  { %27 = vsyncpa [#allocation4], 0  ;;  %s4145_s24 = smov [#allocation5]  }
   0x9   :  { %s43_s25 = sshll.u32 %s4145_s24, 4  ;;  %s44_s25 = int_to_ptr.vmem [resolvable:$true] %s43_s25 }
   0xa   :  { %s3961_s26 = scalar_lea.vmem %s44_s25, 8192  ;;  %p3966_p1 = scmp.lt.s32.totalorder %s44_s25, %s44_s25 }
   0xb   :  { %p3962_p0 = scmp.ne.s32.totalorder %s44_s25, %s3961_s26  ;;  %p3967_p2 = scmp.lt.s32.totalorder %s3961_s26, %s3961_s26 }
   0xd   :  { %p3968_p3 = por %p3967_p2, %p3966_p1 }
   0xf   :  { %p3969_p4 = pnand %p3968_p3, %p3962_p0 }
  0x11   :  { %3972 = shalt.err (!%p3969_p4)
}
  0x12   :  { %s4146_s27 = smov 128   ;;  %s4147_s28 = smov 8  }
  0x13   :  { %s4532_s30 = sld [smem:[#allocation24_spill]]  ;;  %s4148_s18 = smov [#allocation8]  }
  0x14   :  { %s65_s19 = sshll.u32 %s4148_s18, 4  ;;  %s66_s19 = int_to_ptr.vmem [resolvable:$true] %s65_s19 }
  0x15   :  { %s3981_s1 = scalar_lea.vmem %s66_s19, 12288  ;;  %p3986_p6 = scmp.lt.s32.totalorder %s66_s19, %s66_s19 }
  0x16   :  { %p3982_p5 = scmp.ne.s32.totalorder %s66_s19, %s3981_s1  ;;  %p3987_p7 = scmp.lt.s32.totalorder %s3981_s1, %s3981_s1 }
  0x18   :  { %p3988_p8 = por %p3987_p7, %p3986_p6 }
  0x19   :  { %49 = dma.hbm_to_vmem [thread:$0]  %s4532_s30, 8192, %s44_s25, [#allocation6], %s4146_s27, %s4146_s27, %s4147_s28  }
  0x1a   :  { %p3989_p9 = pnand %p3988_p8, %p3982_p5 }
  0x1c   :  { %3992 = shalt.err (!%p3989_p9)
}
  0x1d   :  { %s4149_s20 = smov 384   ;;  %s4150_s21 = smov 24  }
  0x1e   :  { %71 = dma.hbm_to_vmem [thread:$0]  %s4515_s3, 12288, %s66_s19, [#allocation9], %s4149_s20, %s4149_s20, %s4150_s21  }
  0x1f   :  { %s4151_s24 = smov [#allocation11]   ;;  %s4152_s29 = smov [#allocation2]  }
  0x20   :  { %s97_s26 = sshll.u32 %s4151_s24, 4  ;;  %s34_s25 = sshll.u32 %s4152_s29, 4  ;;  %s98_s26 = int_to_ptr.vmem [resolvable:$true] %s97_s26  ;;  %s35_s25 = int_to_ptr.vmem [resolvable:$true] %s34_s25 }
  0x21   :  { %s4001_s0 = scalar_lea.vmem %s98_s26, 4096  ;;  %p4006_p11 = scmp.lt.s32.totalorder %s98_s26, %s98_s26 }
  0x22   :  { %p4002_p10 = scmp.ne.s32.totalorder %s98_s26, %s4001_s0  ;;  %p4007_p12 = scmp.lt.s32.totalorder %s4001_s0, %s4001_s0 }
  0x24   :  { %p4008_p13 = por %p4007_p12, %p4006_p11 }
  0x26   :  { %p4009_p0 = pnand %p4008_p13, %p4002_p10 }
  0x28   :  { %4012 = shalt.err (!%p4009_p0)
}
  0x29   :  { %103 = dma.hbm_to_vmem [thread:$0]  %s4521_s9, 4096, %s98_s26, [#allocation12], %s4146_s27, %s4146_s27, %s4147_s28  }
  0x2a   :  { %s4021_s3 = scalar_lea.vmem %s35_s25, 128  ;;  %p4026_p2 = scmp.lt.s32.totalorder %s35_s25, %s35_s25 }
  0x2b   :  { %p4022_p1 = scmp.ne.s32.totalorder %s35_s25, %s4021_s3  ;;  %p4027_p3 = scmp.lt.s32.totalorder %s4021_s3, %s4021_s3 }
  0x2d   :  { %p4028_p4 = por %p4027_p3, %p4026_p2 }
  0x2f   :  { %p4029_p5 = pnand %p4028_p4, %p4022_p1 }
  0x31   :  { %4032 = shalt.err (!%p4029_p5)
}
  0x32   :  { %s4533_s20 = sld [smem:[#allocation23_spill]]  ;;  %s4153_s21 = smov [#allocation7]  }
  0x33   :  { %s56_s22 = sshll.u32 %s4153_s21, 4  ;;  %s4154_s23 = smov [#allocation10]   ;;  %s57_s22 = int_to_ptr.vmem [resolvable:$true] %s56_s22 }
  0x34   :  { %s79_s24 = sshll.u32 %s4154_s23, 4  ;;  %s4041_s29 = scalar_lea.vmem %s57_s22, 32  ;;  %s80_s24 = int_to_ptr.vmem [resolvable:$true] %s79_s24 }
  0x35   :  { %p4042_p6 = scmp.ne.s32.totalorder %s57_s22, %s4041_s29  ;;  %p4046_p7 = scmp.lt.s32.totalorder %s57_s22, %s57_s22 }
  0x36   :  { %p4047_p8 = scmp.lt.s32.totalorder %s4041_s29, %s4041_s29 }
  0x38   :  { %37 = dma.hbm_to_vmem [thread:$0]  %s4533_s20, 128, %s35_s25, [#allocation3]  }
  0x39   :  { %p4048_p9 = por %p4047_p8, %p4046_p7 }
  0x3b   :  { %p4049_p10 = pnand %p4048_p9, %p4042_p6 }
  0x3d   :  { %4052 = shalt.err (!%p4049_p10)
}
  0x3e   :  { %59 = dma.hbm_to_vmem [thread:$0]  %s4514_s2, 32, %s57_s22, [#allocation6]  }
  0x3f   :  { %s4061_s0 = scalar_lea.vmem %s80_s24, 4096  ;;  %p4066_p12 = scmp.lt.s32.totalorder %s80_s24, %s80_s24 }
  0x40   :  { %p4062_p11 = scmp.ne.s32.totalorder %s80_s24, %s4061_s0  ;;  %p4067_p13 = scmp.lt.s32.totalorder %s4061_s0, %s4061_s0 }
  0x42   :  { %p4068_p0 = por %p4067_p13, %p4066_p12 }
  0x44   :  { %p4069_p1 = pnand %p4068_p0, %p4062_p11 }
  0x46   :  { %4072 = shalt.err (!%p4069_p1)
}
  0x47   :  { %85 = dma.hbm_to_vmem [thread:$0]  %s4517_s5, 4096, %s80_s24, [#allocation9], %s4146_s27, %s4146_s27, %s4147_s28  }
  0x48   :  { %s4155_s18 = smov [#allocation13]   ;;  %s4156_s19 = smov [#allocation14]  }
  0x49   :  { %s111_s3 = sshll.u32 %s4155_s18, 4  ;;  %s129_s1 = sshll.u32 %s4156_s19, 4  ;;  %s112_s3 = int_to_ptr.vmem [resolvable:$true] %s111_s3  ;;  %s130_s1 = int_to_ptr.vmem [resolvable:$true] %s129_s1 }
  0x4a   :  { %s4081_s2 = scalar_lea.vmem %s112_s3, 4096  ;;  %p4086_p3 = scmp.lt.s32.totalorder %s112_s3, %s112_s3 }
  0x4b   :  { %p4082_p2 = scmp.ne.s32.totalorder %s112_s3, %s4081_s2  ;;  %p4087_p4 = scmp.lt.s32.totalorder %s4081_s2, %s4081_s2 }
  0x4d   :  { %p4088_p5 = por %p4087_p4, %p4086_p3 }
  0x4f   :  { %p4089_p6 = pnand %p4088_p5, %p4082_p2 }
  0x51   :  { %4092 = shalt.err (!%p4089_p6)
}
  0x52   :  { %117 = dma.hbm_to_vmem [thread:$0]  %s4523_s11, 4096, %s112_s3, [#allocation12], %s4146_s27, %s4146_s27, %s4147_s28  }
  0x53   :  { %s4101_s5 = scalar_lea.vmem %s130_s1, 2048  ;;  %p4106_p8 = scmp.lt.s32.totalorder %s130_s1, %s130_s1 }
  0x54   :  { %p4102_p7 = scmp.ne.s32.totalorder %s130_s1, %s4101_s5  ;;  %p4107_p9 = scmp.lt.s32.totalorder %s4101_s5, %s4101_s5 }
  0x56   :  { %p4108_p10 = por %p4107_p9, %p4106_p8 }
  0x58   :  { %p4109_p11 = pnand %p4108_p10, %p4102_p7 }
  0x5a   :  { %4112 = shalt.err (!%p4109_p11)
}
  0x5b   :  { %s4157_s22 = smov 64   ;;  %s4158_s23 = smov 4  }
  0x5c   :  { %135 = dma.hbm_to_vmem [thread:$0]  %s4527_s15, 2048, %s130_s1, [#allocation15], %s4157_s22, %s4157_s22, %s4158_s23  }
  0x5d   :  { %4133 = dma.done.wait [#allocation3], 128  }
  0x5e   :  { %4134 = vsyncadd [#allocation3], 4294967168 }
  0x5f   :  { %4135 = dma.done.wait [#allocation6], 8224  }
  0x60   :  { %4136 = vsyncadd [#allocation6], 4294959072 }
  0x61   :  { %4137 = dma.done.wait [#allocation9], 16384  }
  0x62   :  { %4138 = vsyncadd [#allocation9], 4294950912 }
  0x63   :  { %4139 = dma.done.wait [#allocation12], 8192  }
  0x64   :  { %4140 = vsyncadd [#allocation12], 4294959104 }
  0x65   :  { %4141 = dma.done.wait [#allocation15], 2048  }
  0x66   :  { %4142 = vsyncadd [#allocation15], 4294965248  ;;  %v3532_v0 = vld [vmem:[#allocation5 + $0x74] ss:$8 sps:$4 sm:$0xff]   ;;  %v3536_v2 = vld [vmem:[#allocation5 + $0x70] ss:$8 sps:$4 sm:$0xff]   ;;  %v169_v38 = vlaneseq }
  0x67   :  { %v3534_v1 = vld [vmem:[#allocation5 + $0x174] ss:$8 sps:$4 sm:$0xff]   ;;  %586 = vmatprep.subr.bf16.mxu0 %v3532_v0  ;;  %v3537_v3 = vld [vmem:[#allocation5 + $0x170] ss:$8 sps:$4 sm:$0xff]   ;;  %v3538_v4 = vld [vmem:[#allocation5 + $0x64] ss:$8 sps:$4 sm:$0xff]  }
  0x68   :  { %627 = vmatprep.subr.bf16.mxu1 %v3534_v1  ;;  %587 = vmatpush1.bf16.msra.mxu0 %v3536_v2  ;;  %v3540_v5 = vld [vmem:[#allocation5 + $0x164] ss:$8 sps:$4 sm:$0xff]   ;;  %v3542_v6 = vld [vmem:[#allocation5 + $0x60] ss:$8 sps:$4 sm:$0xff]   ;;  %v3544_v8 = vld [vmem:[#allocation5 + $0x54] ss:$8 sps:$4 sm:$0xff]  }
  0x69   :  { %628 = vmatpush1.bf16.msra.mxu1 %v3537_v3  ;;  %588 = vmatprep.subr.bf16.mxu0 %v3538_v4  ;;  %v3543_v7 = vld [vmem:[#allocation5 + $0x160] ss:$8 sps:$4 sm:$0xff]   ;;  %v3546_v9 = vld [vmem:[#allocation5 + $0x154] ss:$8 sps:$4 sm:$0xff]   ;;  %v3548_v10 = vld [vmem:[#allocation5 + $0x50] ss:$8 sps:$4 sm:$0xff]  }
  0x6a   :  { %629 = vmatprep.subr.bf16.mxu1 %v3540_v5  ;;  %v3549_v11 = vld [vmem:[#allocation5 + $0x150] ss:$8 sps:$4 sm:$0xff]   ;;  %v3550_v12 = vld [vmem:[#allocation5 + $0x44] ss:$8 sps:$4 sm:$0xff]   ;;  %v3554_v14 = vld [vmem:[#allocation5 + $0x40] ss:$8 sps:$4 sm:$0xff]  }
  0x6b   :  { %v3552_v13 = vld [vmem:[#allocation5 + $0x144] ss:$8 sps:$4 sm:$0xff]   ;;  %v3555_v15 = vld [vmem:[#allocation5 + $0x140] ss:$8 sps:$4 sm:$0xff]   ;;  %v3556_v16 = vld [vmem:[#allocation5 + $0x34] ss:$8 sps:$4 sm:$0xff]  }
  0x6c   :  { %589 = vmatpush1.bf16.msra.mxu0 %v3542_v6  ;;  %v3558_v17 = vld [vmem:[#allocation5 + $0x134] ss:$8 sps:$4 sm:$0xff]   ;;  %v3560_v18 = vld [vmem:[#allocation5 + $0x30] ss:$8 sps:$4 sm:$0xff]   ;;  %v3562_v20 = vld [vmem:[#allocation5 + $0x24] ss:$8 sps:$4 sm:$0xff]  }
  0x6d   :  { %630 = vmatpush1.bf16.msra.mxu1 %v3543_v7  ;;  %590 = vmatprep.subr.bf16.mxu0 %v3544_v8  ;;  %v3561_v19 = vld [vmem:[#allocation5 + $0x130] ss:$8 sps:$4 sm:$0xff]   ;;  %v3564_v21 = vld [vmem:[#allocation5 + $0x124] ss:$8 sps:$4 sm:$0xff]   ;;  %v3566_v22 = vld [vmem:[#allocation5 + $0x20] ss:$8 sps:$4 sm:$0xff]  }
  0x6e   :  { %631 = vmatprep.subr.bf16.mxu1 %v3546_v9  ;;  %v3567_v23 = vld [vmem:[#allocation5 + $0x120] ss:$8 sps:$4 sm:$0xff]   ;;  %v3568_v24 = vld [vmem:[#allocation5 + $0x14] ss:$8 sps:$4 sm:$0xff]   ;;  %v3572_v26 = vld [vmem:[#allocation5 + $0x10] ss:$8 sps:$4 sm:$0xff]  }
  0x6f   :  { %v3570_v25 = vld [vmem:[#allocation5 + $0x114] ss:$8 sps:$4 sm:$0xff]   ;;  %v3573_v27 = vld [vmem:[#allocation5 + $0x110] ss:$8 sps:$4 sm:$0xff]   ;;  %v3574_v28 = vld [vmem:[#allocation5 + $0x4] ss:$8 sps:$4 sm:$0xff]  }
  0x70   :  { %591 = vmatpush1.bf16.msra.mxu0 %v3548_v10  ;;  %v3576_v29 = vld [vmem:[#allocation5 + $0x104] ss:$8 sps:$4 sm:$0xff]   ;;  %v3578_v30 = vld [vmem:[#allocation5] ss:$8 sps:$4 sm:$0xff]   ;;  %v3580_v32 = vld [vmem:[#allocation5 + $0xf4] ss:$8 sps:$4 sm:$0xff]  }
  0x71   :  { %632 = vmatpush1.bf16.msra.mxu1 %v3549_v11  ;;  %592 = vmatprep.subr.bf16.mxu0 %v3550_v12  ;;  %v3579_v31 = vld [vmem:[#allocation5 + $0x100] ss:$8 sps:$4 sm:$0xff]   ;;  %v3582_v33 = vld [vmem:[#allocation5 + $0x1f4] ss:$8 sps:$4 sm:$0xff]   ;;  %v3584_v34 = vld [vmem:[#allocation5 + $0xf0] ss:$8 sps:$4 sm:$0xff]  }
  0x72   :  { %633 = vmatprep.subr.bf16.mxu1 %v3552_v13  ;;  %v3585_v35 = vld [vmem:[#allocation5 + $0x1f0] ss:$8 sps:$4 sm:$0xff]   ;;  %v4159_v36 = vmov 1983009808   ;;  %v3586_v39 = vld [vmem:[#allocation5 + $0xe4] ss:$8 sps:$4 sm:$0xff]  }
  0x73   :  { %v167_v37 = vunpack.c.l.s4 %v4159_v36  ;;  %v3588_v40 = vld [vmem:[#allocation5 + $0x1e4] ss:$8 sps:$4 sm:$0xff]   ;;  %v3590_v41 = vld [vmem:[#allocation5 + $0xe0] ss:$8 sps:$4 sm:$0xff]   ;;  %v4292_v43 = vshrl.u32 %v169_v38, 7  ;;  %v163_v52 = vld [vmem:[#allocation2] sm:$0xff] }
  0x74   :  { %593 = vmatpush1.bf16.msra.mxu0 %v3554_v14  ;;  %v3591_v44 = vld [vmem:[#allocation5 + $0x1e0] ss:$8 sps:$4 sm:$0xff]   ;;  %v3592_v45 = vld [vmem:[#allocation5 + $0xd4] ss:$8 sps:$4 sm:$0xff]   ;;  %v3596_v47 = vld [vmem:[#allocation5 + $0xd0] ss:$8 sps:$4 sm:$0xff]   ;;  %v165_v55 = vcombine.high %v163_v52, %v163_v52 }
  0x75   :  { %634 = vmatpush1.bf16.msra.mxu1 %v3555_v15  ;;  %594 = vmatprep.subr.bf16.mxu0 %v3556_v16  ;;  %v168_v42 = vunpack.c.0.s8 %v167_v37  ;;  %v3594_v46 = vld [vmem:[#allocation5 + $0x1d4] ss:$8 sps:$4 sm:$0xff]   ;;  %v3597_v48 = vld [vmem:[#allocation5 + $0x1d0] ss:$8 sps:$4 sm:$0xff]   ;;  %v3598_v50 = vld [vmem:[#allocation5 + $0xc4] ss:$8 sps:$4 sm:$0xff]  }
  0x76   :  { %635 = vmatprep.subr.bf16.mxu1 %v3558_v17  ;;  %v3600_v51 = vld [vmem:[#allocation5 + $0x1c4] ss:$8 sps:$4 sm:$0xff]   ;;  %v3602_v53 = vld [vmem:[#allocation5 + $0xc0] ss:$8 sps:$4 sm:$0xff]   ;;  %v3604_v57 = vld [vmem:[#allocation5 + $0xb4] ss:$8 sps:$4 sm:$0xff]  }
  0x77   :  { %v4295_v49 = vsub.s32 %v168_v42, %v4292_v43  ;;  %v3603_v56 = vld [vmem:[#allocation5 + $0x1c0] ss:$8 sps:$4 sm:$0xff]   ;;  %v3606_v58 = vld [vmem:[#allocation5 + $0x1b4] ss:$8 sps:$4 sm:$0xff]   ;;  %v3608_v61 = vld [vmem:[#allocation5 + $0xb0] ss:$8 sps:$4 sm:$0xff]  }
  0x78   :  { %595 = vmatpush1.bf16.msra.mxu0 %v3560_v18  ;;  %v3609_v0 = vld [vmem:[#allocation5 + $0x1b0] ss:$8 sps:$4 sm:$0xff]   ;;  %v3610_v1 = vld [vmem:[#allocation5 + $0xa4] ss:$8 sps:$4 sm:$0xff]   ;;  %v3614_v4 = vld [vmem:[#allocation5 + $0xa0] ss:$8 sps:$4 sm:$0xff]  }
  0x79   :  { %636 = vmatpush1.bf16.msra.mxu1 %v3561_v19  ;;  %596 = vmatprep.subr.bf16.mxu0 %v3562_v20  ;;  %v172_v54 = vrot.slane %v163_v52, %v4295_v49  ;;  %v179_v60 = vrot.slane %v165_v55, %v4295_v49  ;;  %v3612_v2 = vld [vmem:[#allocation5 + $0x1a4] ss:$8 sps:$4 sm:$0xff]   ;;  %v3615_v5 = vld [vmem:[#allocation5 + $0x1a0] ss:$8 sps:$4 sm:$0xff]   ;;  %v3616_v6 = vld [vmem:[#allocation5 + $0x94] ss:$8 sps:$4 sm:$0xff]  }
  0x7a   :  { %637 = vmatprep.subr.bf16.mxu1 %v3564_v21  ;;  %v3618_v7 = vld [vmem:[#allocation5 + $0x194] ss:$8 sps:$4 sm:$0xff]   ;;  %v3620_v8 = vld [vmem:[#allocation5 + $0x90] ss:$8 sps:$4 sm:$0xff]   ;;  %v3622_v10 = vld [vmem:[#allocation5 + $0x84] ss:$8 sps:$4 sm:$0xff]  }
  0x7b   :  { %v180_v59 = vcombine.high %v172_v54, %v172_v54  ;;  %v181_v63 = vcombine.high %v179_v60, %v179_v60  ;;  %v3621_v9 = vld [vmem:[#allocation5 + $0x190] ss:$8 sps:$4 sm:$0xff]   ;;  %v3624_v11 = vld [vmem:[#allocation5 + $0x184] ss:$8 sps:$4 sm:$0xff]   ;;  %v3626_v12 = vld [vmem:[#allocation5 + $0x80] ss:$8 sps:$4 sm:$0xff]   ;;  %v186_v16 = vpack.c.bf16 %v172_v54, %v172_v54  ;;  %v188_v17 = vpack.c.bf16 %v179_v60, %v179_v60 }
  0x7c   :  { %597 = vmatpush1.bf16.msra.mxu0 %v3566_v22  ;;  %v3627_v13 = vld [vmem:[#allocation5 + $0x180] ss:$8 sps:$4 sm:$0xff]   ;;  %v3631_v14 = vld [vmem:[#allocation8 + $0x154] ss:$24 sps:$4 sm:$0xff]   ;;  %v3632_v19 = vld [vmem:[#allocation8 + $0x158] ss:$24 sps:$4 sm:$0xff]  }
  0x7d   :  { %638 = vmatpush1.bf16.msra.mxu1 %v3567_v23  ;;  %598 = vmatprep.subr.bf16.mxu0 %v3568_v24  ;;  %v187_v62 = vpack.c.bf16 %v180_v59, %v180_v59  ;;  %v189_v3 = vpack.c.bf16 %v181_v63, %v181_v63  ;;  %v3634_v15 = vld [vmem:[#allocation8 + $0x15c] ss:$24 sps:$4 sm:$0xff]   ;;  %v3629_v18 = vld [vmem:[#allocation8 + $0x150] ss:$24 sps:$4 sm:$0xff]   ;;  %v3640_v21 = vld [vmem:[#allocation8 + $0x12c] ss:$24 sps:$4 sm:$0xff]  }
  0x7e   :  { %639 = vmatprep.subr.bf16.mxu1 %v3570_v25  ;;  %v3637_v20 = vld [vmem:[#allocation8 + $0x124] ss:$24 sps:$4 sm:$0xff]   ;;  %v3635_v22 = vld [vmem:[#allocation8 + $0x120] ss:$24 sps:$4 sm:$0xff]   ;;  %v3643_v24 = vld [vmem:[#allocation8 + $0xf4] ss:$24 sps:$4 sm:$0xff]  }
  0x7f   :  { %618 = vmatprep.mubr.bf16.mxu0 %v187_v62  ;;  %659 = vmatprep.mubr.bf16.mxu1 %v189_v3  ;;  %v3638_v23 = vld [vmem:[#allocation8 + $0x128] ss:$24 sps:$4 sm:$0xff]   ;;  %v3646_v25 = vld [vmem:[#allocation8 + $0xfc] ss:$24 sps:$4 sm:$0xff]   ;;  %v3664_v37 = vld [vmem:[#allocation8 + $0x6c] ss:$24 sps:$4 sm:$0xff]  }
  0x80   :  { %599 = vmatpush1.bf16.msra.mxu0 %v3572_v26  ;;  %v3641_v26 = vld [vmem:[#allocation8 + $0xf0] ss:$24 sps:$4 sm:$0xff]   ;;  %v3661_v36 = vld [vmem:[#allocation8 + $0x64] ss:$24 sps:$4 sm:$0xff]   ;;  %v3659_v38 = vld [vmem:[#allocation8 + $0x60] ss:$24 sps:$4 sm:$0xff]  }
  0x81   :  { %640 = vmatpush1.bf16.msra.mxu1 %v3573_v27  ;;  %600 = vmatprep.subr.bf16.mxu0 %v3574_v28  ;;  %v3644_v27 = vld [vmem:[#allocation8 + $0xf8] ss:$24 sps:$4 sm:$0xff]   ;;  %v3649_v28 = vld [vmem:[#allocation8 + $0xc4] ss:$24 sps:$4 sm:$0xff]   ;;  %vm4161_vm0 = vmmov 0   ;;  %vm1608_vm1 = vcmask 523264  }
  0x82   :  { %641 = vmatprep.subr.bf16.mxu1 %v3576_v29  ;;  %v3652_v29 = vld [vmem:[#allocation8 + $0xcc] ss:$24 sps:$4 sm:$0xff]   ;;  %v3665_v42 = vld [vmem:[#allocation8 + $0x30] ss:$24 sps:$4 sm:$0xff]   ;;  %v3694_v59 = vld [vmem:[#allocation8 + $0x27c] ss:$24 sps:$4 sm:$0xff]  }
  0x83   :  { %v3677_v52 = vld [vmem:[#allocation8 + $0x2d0] ss:$24 sps:$4 sm:$0xff]   ;;  %v3685_v54 = vld [vmem:[#allocation8 + $0x2a4] ss:$24 sps:$4 sm:$0xff]   ;;  %vm1797_vm2 = vcmask 9216   ;;  %vm1850_vm3 = vcmask 1040384  }
  0x84   :  { %601 = vmatpush1.bf16.msra.mxu0 %v3578_v30  ;;  %v3647_v30 = vld [vmem:[#allocation8 + $0xc0] ss:$24 sps:$4 sm:$0xff]   ;;  %v3688_v55 = vld [vmem:[#allocation8 + $0x2ac] ss:$24 sps:$4 sm:$0xff]   ;;  %v3689_v60 = vld [vmem:[#allocation8 + $0x270] ss:$24 sps:$4 sm:$0xff]  }
  0x85   :  { %642 = vmatpush1.bf16.msra.mxu1 %v3579_v31  ;;  %602 = vmatprep.subr.bf16.mxu0 %v3580_v32  ;;  %v3650_v31 = vld [vmem:[#allocation8 + $0xc8] ss:$24 sps:$4 sm:$0xff]   ;;  %v3655_v32 = vld [vmem:[#allocation8 + $0x94] ss:$24 sps:$4 sm:$0xff]   ;;  %v3697_v62 = vld [vmem:[#allocation8 + $0x244] ss:$24 sps:$4 sm:$0xff]  }
  0x86   :  { %643 = vmatprep.subr.bf16.mxu1 %v3582_v33  ;;  %v3658_v33 = vld [vmem:[#allocation8 + $0x9c] ss:$24 sps:$4 sm:$0xff]   ;;  %v3700_v63 = vld [vmem:[#allocation8 + $0x24c] ss:$24 sps:$4 sm:$0xff]   ;;  %vm1846_vm4 = vcmask 15360   ;;  %vm2348_vm5 = vcmask 1041408  }
  0x87   :  { %v3706_v3 = vld [vmem:[#allocation8 + $0x21c] ss:$24 sps:$4 sm:$0xff]   ;;  %s4163_s3 = smov [#allocation16]  }
  0x88   :  { %603 = vmatpush2.bf16.msra.mxu0 %v3584_v34  ;;  %v3653_v34 = vld [vmem:[#allocation8 + $0x90] ss:$24 sps:$4 sm:$0xff]   ;;  %s3128_s19 = sshll.u32 %s4163_s3, 4  ;;  %s3129_s19 = int_to_ptr.vmem [resolvable:$true] %s3128_s19 }
  0x89   :  { %644 = vmatpush2.bf16.msra.mxu1 %v3585_v35  ;;  %604 = vmatprep.subr.bf16.mxu0 %v3586_v39  ;;  %v3656_v35 = vld [vmem:[#allocation8 + $0x98] ss:$24 sps:$4 sm:$0xff]   ;;  %v3662_v39 = vld [vmem:[#allocation8 + $0x68] ss:$24 sps:$4 sm:$0xff]   ;;  %s4113_s1 = scalar_lea.vmem %s3129_s19, 32  ;;  %p4118_p13 = scmp.lt.s32.totalorder %s3129_s19, %s3129_s19 }
  0x8a   :  { %645 = vmatprep.subr.bf16.mxu1 %v3588_v40  ;;  %v3667_v40 = vld [vmem:[#allocation8 + $0x34] ss:$24 sps:$4 sm:$0xff]   ;;  %p4114_p12 = scmp.ne.s32.totalorder %s3129_s19, %s4113_s1  ;;  %p4119_p0 = scmp.lt.s32.totalorder %s4113_s1, %s4113_s1 }
  0x8c   :  { %605 = vmatpush2.bf16.msra.mxu0 %v3590_v41  ;;  %v3670_v41 = vld [vmem:[#allocation8 + $0x3c] ss:$24 sps:$4 sm:$0xff]   ;;  %p4120_p1 = por %p4119_p0, %p4118_p13 }
  0x8d   :  { %646 = vmatpush2.bf16.msra.mxu1 %v3591_v44  ;;  %606 = vmatprep.subr.bf16.mxu0 %v3592_v45  ;;  %v3668_v44 = vld [vmem:[#allocation8 + $0x38] ss:$24 sps:$4 sm:$0xff]   ;;  %v3673_v45 = vld [vmem:[#allocation8 + $0x4] ss:$24 sps:$4 sm:$0xff]  }
  0x8e   :  { %647 = vmatprep.subr.bf16.mxu1 %v3594_v46  ;;  %v3676_v46 = vld [vmem:[#allocation8 + $0xc] ss:$24 sps:$4 sm:$0xff]   ;;  %p4121_p2 = pnand %p4120_p1, %p4114_p12 }
  0x90   :  { %607 = vmatpush2.bf16.msra.mxu0 %v3596_v47  ;;  %v3671_v47 = vld [vmem:[#allocation8] ss:$24 sps:$4 sm:$0xff]  }
  0x91   :  { %648 = vmatpush2.bf16.msra.mxu1 %v3597_v48  ;;  %608 = vmatprep.subr.bf16.mxu0 %v3598_v50  ;;  %v3674_v48 = vld [vmem:[#allocation8 + $0x8] ss:$24 sps:$4 sm:$0xff]   ;;  %v3679_v50 = vld [vmem:[#allocation8 + $0x2d4] ss:$24 sps:$4 sm:$0xff]  }
  0x92   :  { %649 = vmatprep.subr.bf16.mxu1 %v3600_v51  ;;  %v3682_v51 = vld [vmem:[#allocation8 + $0x2dc] ss:$24 sps:$4 sm:$0xff]  }
  0x94   :  { %609 = vmatpush2.bf16.msra.mxu0 %v3602_v53  ;;  %v3680_v53 = vld [vmem:[#allocation8 + $0x2d8] ss:$24 sps:$4 sm:$0xff]  }
  0x95   :  { %650 = vmatpush2.bf16.msra.mxu1 %v3603_v56  ;;  %610 = vmatprep.subr.bf16.mxu0 %v3604_v57  ;;  %v3683_v56 = vld [vmem:[#allocation8 + $0x2a0] ss:$24 sps:$4 sm:$0xff]  }
  0x96   :  { %651 = vmatprep.subr.bf16.mxu1 %v3606_v58  ;;  %v3686_v57 = vld [vmem:[#allocation8 + $0x2a8] ss:$24 sps:$4 sm:$0xff]   ;;  %v3691_v58 = vld [vmem:[#allocation8 + $0x274] ss:$24 sps:$4 sm:$0xff]  }
  0x98   :  { %611 = vmatpush2.bf16.msra.mxu0 %v3608_v61  ;;  %v3692_v61 = vld [vmem:[#allocation8 + $0x278] ss:$24 sps:$4 sm:$0xff]  }
  0x99   :  { %652 = vmatpush2.bf16.msra.mxu1 %v3609_v0  ;;  %612 = vmatprep.subr.bf16.mxu0 %v3610_v1  ;;  %v3695_v0 = vld [vmem:[#allocation8 + $0x240] ss:$24 sps:$4 sm:$0xff]  }
  0x9a   :  { %653 = vmatprep.subr.bf16.mxu1 %v3612_v2  ;;  %v3698_v1 = vld [vmem:[#allocation8 + $0x248] ss:$24 sps:$4 sm:$0xff]   ;;  %v3703_v2 = vld [vmem:[#allocation8 + $0x214] ss:$24 sps:$4 sm:$0xff]  }
  0x9c   :  { %613 = vmatpush2.bf16.msra.mxu0 %v3614_v4  ;;  %v3701_v4 = vld [vmem:[#allocation8 + $0x210] ss:$24 sps:$4 sm:$0xff]  }
  0x9d   :  { %654 = vmatpush2.bf16.msra.mxu1 %v3615_v5  ;;  %614 = vmatprep.subr.bf16.mxu0 %v3616_v6  ;;  %v3704_v5 = vld [vmem:[#allocation8 + $0x218] ss:$24 sps:$4 sm:$0xff]   ;;  %v3709_v6 = vld [vmem:[#allocation8 + $0x1e4] ss:$24 sps:$4 sm:$0xff]  }
  0x9e   :  { %655 = vmatprep.subr.bf16.mxu1 %v3618_v7  ;;  %v3712_v7 = vld [vmem:[#allocation8 + $0x1ec] ss:$24 sps:$4 sm:$0xff]  }
  0xa0   :  { %615 = vmatpush2.bf16.msra.mxu0 %v3620_v8  ;;  %v3707_v8 = vld [vmem:[#allocation8 + $0x1e0] ss:$24 sps:$4 sm:$0xff]  }
  0xa1   :  { %656 = vmatpush2.bf16.msra.mxu1 %v3621_v9  ;;  %616 = vmatprep.subr.bf16.mxu0 %v3622_v10  ;;  %v3710_v9 = vld [vmem:[#allocation8 + $0x1e8] ss:$24 sps:$4 sm:$0xff]   ;;  %v3715_v10 = vld [vmem:[#allocation8 + $0x1b4] ss:$24 sps:$4 sm:$0xff]  }
  0xa2   :  { %657 = vmatprep.subr.bf16.mxu1 %v3624_v11  ;;  %v3713_v11 = vld [vmem:[#allocation8 + $0x1b0] ss:$24 sps:$4 sm:$0xff]  }
  0xa4   :  { %617 = vmatpush2.bf16.msra.mxu0 %v3626_v12  ;;  %v3718_v12 = vld [vmem:[#allocation8 + $0x1bc] ss:$24 sps:$4 sm:$0xff]  }
  0xa5   :  { %658 = vmatpush2.bf16.msra.mxu1 %v3627_v13  ;;  %1278 = vmatprep.subr.bf16.mxu0 %v3631_v14  ;;  %v3716_v13 = vld [vmem:[#allocation8 + $0x1b8] ss:$24 sps:$4 sm:$0xff]   ;;  %v3721_v14 = vld [vmem:[#allocation8 + $0x184] ss:$24 sps:$4 sm:$0xff]  }
  0xa6   :  { %1319 = vmatprep.subr.bf16.mxu1 %v3634_v15  ;;  %v3719_v15 = vld [vmem:[#allocation8 + $0x180] ss:$24 sps:$4 sm:$0xff]  }
  0xa7   :  { %619 = vmatmul.mubr.bf16.vlgmr.msra.gmra.mxu0 %v186_v16  ;;  %v3724_v16 = vld [vmem:[#allocation8 + $0x18c] ss:$24 sps:$4 sm:$0xff]  }
  0xa8   :  { %660 = vmatmul.mubr.bf16.vlgmr.msra.gmra.mxu1 %v188_v17  ;;  %1279 = vmatpush1.bf16.msra.mxu0 %v3629_v18  ;;  %v3722_v17 = vld [vmem:[#allocation8 + $0x188] ss:$24 sps:$4 sm:$0xff]   ;;  %v3727_v18 = vld [vmem:[#allocation8 + $0x164] ss:$24 sps:$4 sm:$0xff]  }
  0xa9   :  { %1320 = vmatpush1.bf16.msra.mxu1 %v3632_v19  ;;  %1280 = vmatprep.subr.bf16.mxu0 %v3637_v20  ;;  %v4300_v19 = vsub.s32 0, %v4292_v43  ;;  %v254_v20 = vld [vmem:[#allocation7] sm:$0x3] }
  0xaa   :  { %1321 = vmatprep.subr.bf16.mxu1 %v3640_v21  ;;  %v4303_v21 = vsub.s32 1, %v4292_v43 }
  0xac   :  { %1281 = vmatpush1.bf16.msra.mxu0 %v3635_v22  ;;  %v259_v22 = vrot.slane %v254_v20, %v4300_v19 }
  0xad   :  { %1322 = vmatpush1.bf16.msra.mxu1 %v3638_v23  ;;  %1282 = vmatprep.subr.bf16.mxu0 %v3643_v24  ;;  %v263_v23 = vrot.slane %v254_v20, %v4303_v21 }
  0xae   :  { %1323 = vmatprep.subr.bf16.mxu1 %v3646_v25 }
  0xb0   :  { %1283 = vmatpush1.bf16.msra.mxu0 %v3641_v26 }
  0xb1   :  { %1324 = vmatpush1.bf16.msra.mxu1 %v3644_v27  ;;  %1284 = vmatprep.subr.bf16.mxu0 %v3649_v28 }
  0xb2   :  { %1325 = vmatprep.subr.bf16.mxu1 %v3652_v29 }
  0xb4   :  { %1285 = vmatpush1.bf16.msra.mxu0 %v3647_v30 }
  0xb5   :  { %1326 = vmatpush1.bf16.msra.mxu1 %v3650_v31  ;;  %1286 = vmatprep.subr.bf16.mxu0 %v3655_v32 }
  0xb6   :  { %1327 = vmatprep.subr.bf16.mxu1 %v3658_v33 }
  0xb8   :  { %1287 = vmatpush1.bf16.msra.mxu0 %v3653_v34 }
  0xb9   :  { %1328 = vmatpush1.bf16.msra.mxu1 %v3656_v35  ;;  %1288 = vmatprep.subr.bf16.mxu0 %v3661_v36 }
  0xba   :  { %1329 = vmatprep.subr.bf16.mxu1 %v3664_v37  ;;  %v3725_v37 = vld [vmem:[#allocation8 + $0x160] ss:$24 sps:$4 sm:$0xff]  }
  0xbc   :  { %1289 = vmatpush1.bf16.msra.mxu0 %v3659_v38 }
  0xbd   :  { %1330 = vmatpush1.bf16.msra.mxu1 %v3662_v39  ;;  %1290 = vmatprep.subr.bf16.mxu0 %v3667_v40  ;;  %v3730_v39 = vld [vmem:[#allocation8 + $0x134] ss:$24 sps:$4 sm:$0xff]   ;;  %v3728_v40 = vld [vmem:[#allocation8 + $0x130] ss:$24 sps:$4 sm:$0xff]  }
  0xbe   :  { %1331 = vmatprep.subr.bf16.mxu1 %v3670_v41  ;;  %v3733_v41 = vld [vmem:[#allocation8 + $0x104] ss:$24 sps:$4 sm:$0xff]  }
  0xc0   :  { %1291 = vmatpush1.bf16.msra.mxu0 %v3665_v42  ;;  %v3731_v42 = vld [vmem:[#allocation8 + $0x100] ss:$24 sps:$4 sm:$0xff]  }
  0xc1   :  { %1332 = vmatpush1.bf16.msra.mxu1 %v3668_v44  ;;  %1292 = vmatprep.subr.bf16.mxu0 %v3673_v45  ;;  %v3736_v44 = vld [vmem:[#allocation8 + $0xd4] ss:$24 sps:$4 sm:$0xff]   ;;  %v3734_v45 = vld [vmem:[#allocation8 + $0xd0] ss:$24 sps:$4 sm:$0xff]  }
  0xc2   :  { %1333 = vmatprep.subr.bf16.mxu1 %v3676_v46  ;;  %v3739_v46 = vld [vmem:[#allocation8 + $0xa4] ss:$24 sps:$4 sm:$0xff]  }
  0xc4   :  { %1293 = vmatpush1.bf16.msra.mxu0 %v3671_v47  ;;  %v3737_v47 = vld [vmem:[#allocation8 + $0xa0] ss:$24 sps:$4 sm:$0xff]  }
  0xc5   :  { %1334 = vmatpush1.bf16.msra.mxu1 %v3674_v48  ;;  %1294 = vmatprep.subr.bf16.mxu0 %v3679_v50  ;;  %v3742_v48 = vld [vmem:[#allocation8 + $0x74] ss:$24 sps:$4 sm:$0xff]   ;;  %v3740_v50 = vld [vmem:[#allocation8 + $0x70] ss:$24 sps:$4 sm:$0xff]  }
  0xc6   :  { %1335 = vmatprep.subr.bf16.mxu1 %v3682_v51  ;;  %v3745_v51 = vld [vmem:[#allocation8 + $0x44] ss:$24 sps:$4 sm:$0xff]  }
  0xc8   :  { %1295 = vmatpush2.bf16.msra.mxu0 %v3677_v52  ;;  %v3743_v52 = vld [vmem:[#allocation8 + $0x40] ss:$24 sps:$4 sm:$0xff]  }
  0xc9   :  { %1336 = vmatpush2.bf16.msra.mxu1 %v3680_v53  ;;  %1296 = vmatprep.subr.bf16.mxu0 %v3685_v54  ;;  %v3748_v53 = vld [vmem:[#allocation8 + $0x14] ss:$24 sps:$4 sm:$0xff]   ;;  %v3746_v54 = vld [vmem:[#allocation8 + $0x10] ss:$24 sps:$4 sm:$0xff]  }
  0xca   :  { %1337 = vmatprep.subr.bf16.mxu1 %v3688_v55  ;;  %v3751_v55 = vld [vmem:[#allocation8 + $0x2e4] ss:$24 sps:$4 sm:$0xff]  }
  0xcc   :  { %1297 = vmatpush2.bf16.msra.mxu0 %v3683_v56  ;;  %v3749_v56 = vld [vmem:[#allocation8 + $0x2e0] ss:$24 sps:$4 sm:$0xff]  }
  0xcd   :  { %1338 = vmatpush2.bf16.msra.mxu1 %v3686_v57  ;;  %1298 = vmatprep.subr.bf16.mxu0 %v3691_v58  ;;  %v3754_v57 = vld [vmem:[#allocation8 + $0x2b4] ss:$24 sps:$4 sm:$0xff]   ;;  %v3752_v58 = vld [vmem:[#allocation8 + $0x2b0] ss:$24 sps:$4 sm:$0xff]  }
  0xce   :  { %1339 = vmatprep.subr.bf16.mxu1 %v3694_v59  ;;  %v3757_v59 = vld [vmem:[#allocation8 + $0x284] ss:$24 sps:$4 sm:$0xff]  }
  0xd0   :  { %1299 = vmatpush2.bf16.msra.mxu0 %v3689_v60  ;;  %v3755_v60 = vld [vmem:[#allocation8 + $0x280] ss:$24 sps:$4 sm:$0xff]  }
  0xd1   :  { %1340 = vmatpush2.bf16.msra.mxu1 %v3692_v61  ;;  %1300 = vmatprep.subr.bf16.mxu0 %v3697_v62  ;;  %v3760_v61 = vld [vmem:[#allocation8 + $0x254] ss:$24 sps:$4 sm:$0xff]   ;;  %v3758_v62 = vld [vmem:[#allocation8 + $0x250] ss:$24 sps:$4 sm:$0xff]  }
  0xd2   :  { %1341 = vmatprep.subr.bf16.mxu1 %v3700_v63  ;;  %v3763_v63 = vld [vmem:[#allocation8 + $0x224] ss:$24 sps:$4 sm:$0xff]  }
  0xd4   :  { %1301 = vmatpush2.bf16.msra.mxu0 %v3695_v0  ;;  %v3761_v0 = vld [vmem:[#allocation8 + $0x220] ss:$24 sps:$4 sm:$0xff]  }
  0xd5   :  { %1342 = vmatpush2.bf16.msra.mxu1 %v3698_v1  ;;  %1302 = vmatprep.subr.bf16.mxu0 %v3703_v2  ;;  %v3766_v1 = vld [vmem:[#allocation8 + $0x1f4] ss:$24 sps:$4 sm:$0xff]   ;;  %v3764_v2 = vld [vmem:[#allocation8 + $0x1f0] ss:$24 sps:$4 sm:$0xff]  }
  0xd6   :  { %1343 = vmatprep.subr.bf16.mxu1 %v3706_v3  ;;  %v3769_v3 = vld [vmem:[#allocation8 + $0x1c4] ss:$24 sps:$4 sm:$0xff]  }
  0xd8   :  { %1303 = vmatpush2.bf16.msra.mxu0 %v3701_v4  ;;  %v3767_v4 = vld [vmem:[#allocation8 + $0x1c0] ss:$24 sps:$4 sm:$0xff]  }
  0xd9   :  { %1344 = vmatpush2.bf16.msra.mxu1 %v3704_v5  ;;  %1304 = vmatprep.subr.bf16.mxu0 %v3709_v6  ;;  %v3772_v5 = vld [vmem:[#allocation8 + $0x194] ss:$24 sps:$4 sm:$0xff]   ;;  %v3770_v6 = vld [vmem:[#allocation8 + $0x190] ss:$24 sps:$4 sm:$0xff]  }
  0xda   :  { %1345 = vmatprep.subr.bf16.mxu1 %v3712_v7  ;;  %v4160_v7 = vmov 0.0  }
  0xdc   :  { %1305 = vmatpush2.bf16.msra.mxu0 %v3707_v8  ;;  %v778_v8 = vsub.s32 2, %v4292_v43 }
  0xdd   :  { %1346 = vmatpush2.bf16.msra.mxu1 %v3710_v9  ;;  %1306 = vmatprep.subr.bf16.mxu0 %v3715_v10  ;;  %v4325_v9 = vld [vmem:[%s4516_s4] sm:$0x3f]  ;;  %v782_v10 = vsub.s32 3, %v4292_v43 }
  0xde   :  { %1347 = vmatprep.subr.bf16.mxu1 %v3718_v12  ;;  %v779_v12 = vrot.slane %v4325_v9, %v778_v8 }
  0xe0   :  { %1307 = vmatpush2.bf16.msra.mxu0 %v3713_v11  ;;  %v771_v11 = vrot.slane %v4325_v9, %v4300_v19 }
  0xe1   :  { %1348 = vmatpush2.bf16.msra.mxu1 %v3716_v13  ;;  %1308 = vmatprep.subr.bf16.mxu0 %v3721_v14  ;;  %v775_v13 = vrot.slane %v4325_v9, %v4303_v21  ;;  %v783_v14 = vrot.slane %v4325_v9, %v782_v10 }
  0xe2   :  { %1349 = vmatprep.subr.bf16.mxu1 %v3724_v16 }
  0xe4   :  { %1309 = vmatpush2.bf16.msra.mxu0 %v3719_v15 }
  0xe5   :  { %1350 = vmatpush2.bf16.msra.mxu1 %v3722_v17  ;;  %1360 = vmatprep.subr.bf16.mxu0 %v3727_v18 }
  0xe6   :  { %3460 = vmatprep.subr.bf16.mxu1 %v4160_v7 }
 0x167   :  { %v620_v24 = vpop.f32.mrf.mxu0 }
 0x168   :  { %v661_v25 = vpop.f32.mrf.mxu1  ;;  %v621_v26 = vadd.f32 %v620_v24, %v259_v22 }
 0x169   :  { %v622_v27 = vpop.f32.mrf.mxu0 }
 0x16a   :  { %v663_v28 = vpop.f32.mrf.mxu1  ;;  %v623_v29 = vadd.f32 %v622_v27, %v263_v23  ;;  %v4307_v30 = vadd.f32 %v661_v25, %v621_v26 }
 0x16b   :  { %v624_v31 = vpop.f32.mrf.mxu0 }
 0x16c   :  { %v665_v32 = vpop.f32.mrf.mxu1  ;;  %v4309_v33 = vadd.f32 %v663_v28, %v623_v29  ;;  %v4315_v38 = vpack.c.bf16 %v4307_v30, %v4307_v30 }
 0x16d   :  { %v625_v34 = vpop.f32.mrf.mxu0 }
 0x16e   :  { %v666_v35 = vpop.f32.mrf.mxu1  ;;  %v669_v36 = vpack.c.bf16 %v4309_v33, %v4309_v33 }
 0x170   :  { %1310 = vmatprep.mubr.bf16.mxu0 %v669_v36  ;;  %1351 = vmatprep.mubr.bf16.mxu1 %v669_v36 }
 0x171   :  { %1311 = vmatmul.mubr.bf16.vlgmr.msra.gmra.mxu0 %v4315_v38  ;;  %1352 = vmatmul.mubr.bf16.vlgmr.msra.gmra.mxu1 %v4315_v38 }
 0x172   :  { %1361 = vmatpush1.bf16.msra.mxu0 %v3725_v37  ;;  %1392 = vmatprep.mubr.bf16.mxu0 %v669_v36  ;;  %v4162_v37 = vmov 1934713408  }
 0x173   :  { %1362 = vmatprep.subr.bf16.mxu0 %v3730_v39  ;;  %3462 = vmatprep.mubr.msk.bf16.mxu1 %vm4161_vm0, %v4160_v7 }
 0x176   :  { %1363 = vmatpush1.bf16.msra.mxu0 %v3728_v40 }
 0x177   :  { %1364 = vmatprep.subr.bf16.mxu0 %v3733_v41 }
 0x17a   :  { %1365 = vmatpush1.bf16.msra.mxu0 %v3731_v42 }
 0x17b   :  { %1366 = vmatprep.subr.bf16.mxu0 %v3736_v44 }
 0x17e   :  { %1367 = vmatpush1.bf16.msra.mxu0 %v3734_v45 }
 0x17f   :  { %1368 = vmatprep.subr.bf16.mxu0 %v3739_v46 }
 0x182   :  { %1369 = vmatpush1.bf16.msra.mxu0 %v3737_v47 }
 0x183   :  { %1370 = vmatprep.subr.bf16.mxu0 %v3742_v48 }
 0x186   :  { %1371 = vmatpush1.bf16.msra.mxu0 %v3740_v50 }
 0x187   :  { %1372 = vmatprep.subr.bf16.mxu0 %v3745_v51 }
 0x18a   :  { %1373 = vmatpush1.bf16.msra.mxu0 %v3743_v52 }
 0x18b   :  { %1374 = vmatprep.subr.bf16.mxu0 %v3748_v53 }
 0x18e   :  { %1375 = vmatpush1.bf16.msra.mxu0 %v3746_v54 }
 0x18f   :  { %1376 = vmatprep.subr.bf16.mxu0 %v3751_v55 }
 0x192   :  { %1377 = vmatpush2.bf16.msra.mxu0 %v3749_v56 }
 0x193   :  { %1378 = vmatprep.subr.bf16.mxu0 %v3754_v57 }
 0x196   :  { %1379 = vmatpush2.bf16.msra.mxu0 %v3752_v58 }
 0x197   :  { %1380 = vmatprep.subr.bf16.mxu0 %v3757_v59 }
 0x19a   :  { %1381 = vmatpush2.bf16.msra.mxu0 %v3755_v60 }
 0x19b   :  { %1382 = vmatprep.subr.bf16.mxu0 %v3760_v61 }
 0x19e   :  { %1383 = vmatpush2.bf16.msra.mxu0 %v3758_v62 }
 0x19f   :  { %1384 = vmatprep.subr.bf16.mxu0 %v3763_v63 }
 0x1a2   :  { %1385 = vmatpush2.bf16.msra.mxu0 %v3761_v0 }
 0x1a3   :  { %1386 = vmatprep.subr.bf16.mxu0 %v3766_v1 }
 0x1a6   :  { %1387 = vmatpush2.bf16.msra.mxu0 %v3764_v2 }
 0x1a7   :  { %1388 = vmatprep.subr.bf16.mxu0 %v3769_v3 }
 0x1aa   :  { %1389 = vmatpush2.bf16.msra.mxu0 %v3767_v4 }
 0x1ab   :  { %1390 = vmatprep.subr.bf16.mxu0 %v3772_v5 }
 0x1ae   :  { %1391 = vmatpush2.bf16.msra.mxu0 %v3770_v6 }
 0x1b1   :  { %1393 = vmatmul.mubr.bf16.vlgmr.msra.gmra.mxu0 %v4315_v38  ;;  %v1427_v38 = vunpack.c.l.s4 %v4162_v37 }
 0x1b3   :  { %v1428_v41 = vunpack.c.0.s8 %v1427_v38 }
 0x1b5   :  { %v4345_v47 = vsub.s32 %v1428_v41, %v4292_v43 }
 0x231   :  { %v1312_v15 = vpop.f32.mrf.mxu0  ;;  %v1353_v16 = vpop.f32.mrf.mxu1 }
 0x232   :  { %v1313_v17 = vadd.f32 %v1312_v15, %v771_v11  ;;  %v1354_v18 = vadd.f32 %v1353_v16, %v779_v12 }
 0x233   :  { %v1314_v20 = vpop.f32.mrf.mxu0  ;;  %v1355_v22 = vpop.f32.mrf.mxu1 }
 0x234   :  { %v1315_v23 = vadd.f32 %v1314_v20, %v775_v13  ;;  %v1356_v24 = vadd.f32 %v1355_v22, %v783_v14  ;;  %1471 = vrot.lane.b32.xlu0 %v1354_v18, %s4157_s22  ;;  %1402 = vrot.lane.b32.xlu1 %v1313_v17, %s4157_s22 }
 0x235   :  { %v1316_v25 = vpop.f32.mrf.mxu0  ;;  %v1357_v26 = vpop.f32.mrf.mxu1 }
 0x236   :  { %v1409_v27 = vcombine.low %v1313_v17, %v1315_v23  ;;  %v1478_v28 = vcombine.low %v1354_v18, %v1356_v24 }
 0x237   :  { %v1317_v29 = vpop.f32.mrf.mxu0  ;;  %v1358_v31 = vpop.f32.mrf.mxu1 }
 0x238   :  { %1475 = vrot.lane.b32.xlu0 %v1356_v24, %s4157_s22  ;;  %1406 = vrot.lane.b32.xlu1 %v1315_v23, %s4157_s22  ;;  %v1416_v48 = vrot.slane %v1409_v27, %v4295_v49  ;;  %v1485_v50 = vrot.slane %v1478_v28, %v4295_v49 }
 0x271   :  { %v4340_v32 = vpop.f32.mrf.mxu0 }
 0x273   :  { %v4342_v34 = vpop.f32.mrf.mxu0 }
 0x275   :  { %v1398_v35 = vpop.f32.mrf.mxu0 }
 0x277   :  { %v1399_v36 = vpop.f32.mrf.mxu0 }
 0x2a6   :  { %v1472_v39 = vpop.permute.xlu0 %1471  ;;  %v1403_v40 = vpop.permute.xlu1 %1402 }
 0x2aa   :  { %v1476_v42 = vpop.permute.xlu0 %1475  ;;  %v1407_v44 = vpop.permute.xlu1 %1406 }
 0x2ab   :  { %v1486_v45 = vcombine.low %v1472_v39, %v1476_v42  ;;  %v1417_v46 = vcombine.low %v1403_v40, %v1407_v44 }
 0x2ad   :  { %v1493_v51 = vrot.slane %v1486_v45, %v4295_v49  ;;  %v1424_v52 = vrot.slane %v1417_v46, %v4295_v49 }
 0x2af   :  { %v1494_v53 = vcombine.low %v1485_v50, %v1493_v51  ;;  %v1425_v54 = vcombine.low %v1416_v48, %v1424_v52 }
 0x2b1   :  { %v1501_v55 = vrot.slane %v1494_v53, %v4345_v47  ;;  %v1432_v56 = vrot.slane %v1425_v54, %v4345_v47 }
 0x2b3   :  { %v1509_v57 = vcombine.high %v1501_v55, %v4160_v7  ;;  %v1440_v58 = vcombine.high %v1432_v56, %v4160_v7  ;;  %v1508_v59 = vrot.slane %v1501_v55, %v4295_v49  ;;  %v1439_v63 = vrot.slane %v1432_v56, %v4295_v49 }
 0x2b5   :  { %v1516_v60 = vrot.slane %v1509_v57, %v4295_v49  ;;  %v1447_v61 = vrot.slane %v1440_v58, %v4295_v49  ;;  %v786_v58 = vsub.s32 4, %v4292_v43 }
 0x2b7   :  { %v1517_v62 = vcombine.low %v1508_v59, %v1516_v60  ;;  %v1448_v1 = vcombine.low %v1439_v63, %v1447_v61  ;;  %v1518_v8 = vcombine.high %v1508_v59, %v1516_v60  ;;  %v1449_v15 = vcombine.high %v1439_v63, %v1447_v61 }
 0x2b8   :  { %v787_v59 = vrot.slane %v4325_v9, %v786_v58 }
 0x2b9   :  { %v1525_v0 = vrot.slane %v1517_v62, %v4345_v47  ;;  %v1456_v5 = vrot.slane %v1448_v1, %v4345_v47  ;;  %v1532_v12 = vrot.slane %v1518_v8, %v4345_v47  ;;  %v1463_v20 = vrot.slane %v1449_v15, %v4345_v47 }
 0x2ba   :  { %v1395_v60 = vadd.f32 %v4340_v32, %v787_v59  ;;  %v790_v8 = vsub.s32 5, %v4292_v43 }
 0x2bb   :  { %v1535_v2 = vpack.c.bf16 %v1525_v0, %v1525_v0  ;;  %v1533_v4 = vcombine.high %v1525_v0, %v4160_v7  ;;  %v1466_v10 = vpack.c.bf16 %v1456_v5, %v1456_v5  ;;  %v1464_v13 = vcombine.high %v1456_v5, %v4160_v7 }
 0x2bc   :  { %v1537_v14 = vpack.c.bf16 %v1532_v12, %v1532_v12  ;;  %v1534_v18 = vcombine.high %v1532_v12, %v4160_v7  ;;  %v1468_v23 = vpack.c.bf16 %v1463_v20, %v1463_v20  ;;  %v1465_v25 = vcombine.high %v1463_v20, %v4160_v7 }
 0x2bd   :  { %v1613_v3 = vsel %vm1608_vm1, %v1535_v2, 0  ;;  %v1536_v6 = vpack.c.bf16 %v1533_v4, %v1533_v4  ;;  %v1467_v16 = vpack.c.bf16 %v1464_v13, %v1464_v13  ;;  %v791_v32 = vrot.slane %v4325_v9, %v790_v8  ;;  %v3776_v8 = vld [vmem:[#allocation10 + $0x60] ss:$8 sps:$4 sm:$0xff]  }
 0x2be   :  { %3461 = vmatpush3.bf16.xpose.msra.mxu1 %v1613_v3  ;;  %v1705_v17 = vsel %vm1608_vm1, %v1537_v14, 0  ;;  %v1538_v22 = vpack.c.bf16 %v1534_v18, %v1534_v18  ;;  %v1469_v26 = vpack.c.bf16 %v1465_v25, %v1465_v25 }
 0x2bf   :  { %3466 = vmatprep.subr.bf16.mxu1 %v4160_v7  ;;  %v1659_v11 = vsel %vm1608_vm1, %v1536_v6, 0  ;;  %v1397_v12 = vadd.f32 %v4342_v34, %v791_v32  ;;  %v3779_v32 = vld [vmem:[#allocation10 + $0x50] ss:$8 sps:$4 sm:$0xff]  }
 0x2c0   :  { %v1751_v24 = vsel %vm1608_vm1, %v1538_v22, 0 }
 0x2c1   :  { %v1547_v20 = vcombine.low %v1395_v60, %v1397_v12 }
 0x2c3   :  { %v1554_v25 = vrot.slane %v1547_v20, %v4295_v49  ;;  %v3797_v20 = vld [vmem:[#allocation10 + $0xf0] ss:$8 sps:$4 sm:$0xff]  }
 0x2c5   :  { %3463 = vmatmul.mubr.msk.bf16.vlgmr.msra.gmra.mxu1 %vm1608_vm1, %v1466_v10 }
 0x2c6   :  { %3467 = vmatpush3.bf16.xpose.msra.mxu1 %v1659_v11  ;;  %3468 = vmatprep.mubr.msk.bf16.mxu1 %vm4161_vm0, %v4160_v7 }
 0x2c7   :  { %3472 = vmatprep.subr.bf16.mxu1 %v4160_v7 }
 0x2cd   :  { %3469 = vmatmul.mubr.msk.bf16.vlgmr.msra.gmra.mxu1 %vm1608_vm1, %v1467_v16 }
 0x2ce   :  { %3473 = vmatpush3.bf16.xpose.msra.mxu1 %v1705_v17  ;;  %3474 = vmatprep.mubr.msk.bf16.mxu1 %vm4161_vm0, %v4160_v7 }
 0x2cf   :  { %3478 = vmatprep.subr.bf16.mxu1 %v4160_v7 }
 0x2d5   :  { %3475 = vmatmul.mubr.msk.bf16.vlgmr.msra.gmra.mxu1 %vm1608_vm1, %v1468_v23 }
 0x2d6   :  { %3479 = vmatpush3.bf16.xpose.msra.mxu1 %v1751_v24  ;;  %3480 = vmatprep.mubr.msk.bf16.mxu1 %vm4161_vm0, %v4160_v7 }
 0x2d7   :  { %3484 = vmatprep.subr.bf16.mxu1 %v4160_v7 }
 0x2dd   :  { %3481 = vmatmul.mubr.msk.bf16.vlgmr.msra.gmra.mxu1 %vm1608_vm1, %v1469_v26 }
 0x2de   :  { %3486 = vmatprep.mubr.msk.bf16.mxu1 %vm4161_vm0, %v4160_v7 }
 0x385   :  { %v1649_v27 = vpop.f32.mrf.mxu1 }
 0x386   :  { %v1793_v28 = vmul.f32 0.125, %v1649_v27 }
 0x387   :  { %v3464_v29 = vpop.f32.mrf.mxu1 }
 0x388   :  { %v1798_v31 = vsel %vm1797_vm2, %v1793_v28, -inf }
 0x389   :  { %1799 = vmax.xlane.f32.xlu0 %v1798_v31  ;;  %v1652_v35 = vpop.f32.mrf.mxu1 }
 0x38b   :  { %v3465_v36 = vpop.f32.mrf.mxu1 }
 0x38d   :  { %v1695_v37 = vpop.f32.mrf.mxu1 }
 0x38e   :  { %v1794_v38 = vmul.f32 0.125, %v1695_v37 }
 0x38f   :  { %v3470_v39 = vpop.f32.mrf.mxu1 }
 0x390   :  { %v1801_v40 = vsel %vm1797_vm2, %v1794_v38, -inf }
 0x391   :  { %1802 = vmax.xlane.f32.xlu1 %v1801_v40  ;;  %v1698_v41 = vpop.f32.mrf.mxu1 }
 0x393   :  { %v3471_v42 = vpop.f32.mrf.mxu1 }
 0x395   :  { %v1741_v44 = vpop.f32.mrf.mxu1 }
 0x396   :  { %v1795_v45 = vmul.f32 0.125, %v1741_v44 }
 0x397   :  { %v3476_v46 = vpop.f32.mrf.mxu1 }
 0x398   :  { %v1804_v48 = vsel %vm1797_vm2, %v1795_v45, -inf }
 0x399   :  { %1805 = vmax.xlane.f32.xlu0 %v1804_v48  ;;  %v1744_v50 = vpop.f32.mrf.mxu1 }
 0x39b   :  { %v3477_v51 = vpop.f32.mrf.mxu1 }
 0x39d   :  { %v1787_v52 = vpop.f32.mrf.mxu1 }
 0x39e   :  { %v1796_v53 = vmul.f32 0.125, %v1787_v52 }
 0x39f   :  { %v3482_v54 = vpop.f32.mrf.mxu1 }
 0x3a0   :  { %v1807_v55 = vsel %vm1797_vm2, %v1796_v53, -inf }
 0x3a1   :  { %1808 = vmax.xlane.f32.xlu0 %v1807_v55  ;;  %v1790_v56 = vpop.f32.mrf.mxu1 }
 0x3a3   :  { %v3483_v57 = vpop.f32.mrf.mxu1 }
 0x3b7   :  { %1540 = vrot.lane.b32.xlu0 %v1395_v60, %s4157_s22 }
 0x412   :  { %v1800_v61 = vpop.xlane.xlu0 %1799 }
 0x413   :  { %v1810_v62 = vsub.f32 %v1793_v28, %v1800_v61 }
 0x415   :  { %v1814_v63 = vmul.f32 1.442695, %v1810_v62 }
 0x417   :  { %3933 = vpow2.f32 %v1814_v63 }
 0x41a   :  { %v1803_v43 = vpop.xlane.xlu1 %1802 }
 0x41b   :  { %v1811_v16 = vsub.f32 %v1794_v38, %v1803_v43  ;;  %v3788_v43 = vld [vmem:[#allocation10 + $0x20] ss:$8 sps:$4 sm:$0xff]  }
 0x41d   :  { %v1816_v17 = vmul.f32 1.442695, %v1811_v16  ;;  %v3793_v16 = vld [vmem:[#allocation10 + $0x14] ss:$8 sps:$4 sm:$0xff]  }
 0x422   :  { %v1806_v0 = vpop.xlane.xlu0 %1805 }
 0x423   :  { %v1812_v1 = vsub.f32 %v1795_v45, %v1806_v0 }
 0x424   :  { %v3934_v2 = vpop.eup %3933 }
 0x425   :  { %v1818_v3 = vmul.f32 1.442695, %v1812_v1  ;;  %v1822_v4 = vsel %vm1797_vm2, %v3934_v2, 0.0 }
 0x426   :  { %1823 = vadd.xlane.f32.xlu1 %v1822_v4  ;;  %v3773_v4 = vld [vmem:[#allocation10 + $0x70] ss:$8 sps:$4 sm:$0xff]  }
 0x427   :  { %3935 = vpow2.f32 %v1818_v3 }
 0x42a   :  { %v1809_v5 = vpop.xlane.xlu0 %1808 }
 0x42b   :  { %v1813_v6 = vsub.f32 %v1796_v53, %v1809_v5  ;;  %v3775_v5 = vld [vmem:[#allocation10 + $0x74] ss:$8 sps:$4 sm:$0xff]  }
 0x42c   :  { %2305 = vmatprep.subr.bf16.mxu0 %v3775_v5 }
 0x42d   :  { %v1820_v10 = vmul.f32 1.442695, %v1813_v6  ;;  %v3778_v6 = vld [vmem:[#allocation10 + $0x64] ss:$8 sps:$4 sm:$0xff]   ;;  %2306 = vmatpush1.bf16.msra.mxu0 %v3773_v4 }
 0x42e   :  { %v1541_v22 = vpop.permute.xlu0 %1540  ;;  %2307 = vmatprep.subr.bf16.mxu0 %v3778_v6 }
 0x42f   :  { %3937 = vpow2.f32 %v1820_v10  ;;  %v3781_v10 = vld [vmem:[#allocation10 + $0x54] ss:$8 sps:$4 sm:$0xff]  }
 0x430   :  { %3939 = vpow2.f32 %v1816_v17  ;;  %v3791_v17 = vld [vmem:[#allocation10 + $0x10] ss:$8 sps:$4 sm:$0xff]  }
 0x431   :  { %2308 = vmatpush1.bf16.msra.mxu0 %v3776_v8 }
 0x432   :  { %2309 = vmatprep.subr.bf16.mxu0 %v3781_v10 }
 0x434   :  { %v4398_v11 = vpop.eup %3935 }
 0x435   :  { %v1828_v13 = vsel %vm1797_vm2, %v4398_v11, 0.0  ;;  %2310 = vmatpush1.bf16.msra.mxu0 %v3779_v32 }
 0x436   :  { %1829 = vadd.xlane.f32.xlu0 %v1828_v13  ;;  %v3787_v13 = vld [vmem:[#allocation10 + $0x34] ss:$8 sps:$4 sm:$0xff]  }
 0x437   :  { %1544 = vrot.lane.b32.xlu1 %v1397_v12, %s4157_s22  ;;  %v3782_v12 = vld [vmem:[#allocation10 + $0x40] ss:$8 sps:$4 sm:$0xff]  }
 0x43c   :  { %v4404_v14 = vpop.eup %3937 }
 0x43d   :  { %v1831_v15 = vsel %vm1797_vm2, %v4404_v14, 0.0  ;;  %v3940_v9 = vpop.eup %3939 }
 0x43e   :  { %1832 = vadd.xlane.f32.xlu0 %v1831_v15  ;;  %v1825_v18 = vsel %vm1797_vm2, %v3940_v9, 0.0  ;;  %v3790_v15 = vld [vmem:[#allocation10 + $0x24] ss:$8 sps:$4 sm:$0xff]  }
 0x45b   :  { %1826 = vadd.xlane.f32.xlu1 %v1825_v18  ;;  %v3794_v18 = vld [vmem:[#allocation10] ss:$8 sps:$4 sm:$0xff]  }
 0x4af   :  { %v1824_v34 = vpop.xlane.xlu1 %1823 }
 0x4b0   :  { %3941 = vrcp.f32 %v1824_v34  ;;  %v3799_v34 = vld [vmem:[#allocation10 + $0xf4] ss:$8 sps:$4 sm:$0xff]  }
 0x4b3   :  { %v1545_v23 = vpop.permute.xlu1 %1544 }
 0x4b4   :  { %v1555_v24 = vcombine.low %v1541_v22, %v1545_v23  ;;  %v3802_v22 = vld [vmem:[#allocation10 + $0xe4] ss:$8 sps:$4 sm:$0xff]   ;;  %v3800_v23 = vld [vmem:[#allocation10 + $0xe0] ss:$8 sps:$4 sm:$0xff]  }
 0x4b6   :  { %v1562_v26 = vrot.slane %v1555_v24, %v4295_v49  ;;  %v3805_v24 = vld [vmem:[#allocation10 + $0xd4] ss:$8 sps:$4 sm:$0xff]  }
 0x4b8   :  { %v1563_v27 = vcombine.low %v1554_v25, %v1562_v26  ;;  %v3803_v25 = vld [vmem:[#allocation10 + $0xd0] ss:$8 sps:$4 sm:$0xff]   ;;  %v3808_v26 = vld [vmem:[#allocation10 + $0xc4] ss:$8 sps:$4 sm:$0xff]  }
 0x4ba   :  { %v1570_v28 = vrot.slane %v1563_v27, %v4345_v47  ;;  %v3806_v27 = vld [vmem:[#allocation10 + $0xc0] ss:$8 sps:$4 sm:$0xff]  }
 0x4bc   :  { %v1578_v29 = vcombine.high %v1570_v28, %v4160_v7  ;;  %v1577_v31 = vrot.slane %v1570_v28, %v4295_v49  ;;  %v3811_v28 = vld [vmem:[#allocation10 + $0xb4] ss:$8 sps:$4 sm:$0xff]  }
 0x4bd   :  { %v3942_v37 = vpop.eup %3941 }
 0x4be   :  { %v1585_v35 = vrot.slane %v1578_v29, %v4295_v49  ;;  %v1838_v40 = vmul.f32 %v3942_v37, %v3934_v2 }
 0x4bf   :  { %v1830_v50 = vpop.xlane.xlu0 %1829 }
 0x4c0   :  { %v1586_v36 = vcombine.low %v1577_v31, %v1585_v35  ;;  %v1842_v45 = vpack.c.bf16 %v1838_v40, %v1838_v40  ;;  %v1587_v51 = vcombine.high %v1577_v31, %v1585_v35  ;;  %v3809_v31 = vld [vmem:[#allocation10 + $0xb0] ss:$8 sps:$4 sm:$0xff]   ;;  %v3817_v40 = vld [vmem:[#allocation10 + $0x94] ss:$8 sps:$4 sm:$0xff]  }
 0x4c2   :  { %v1594_v38 = vrot.slane %v1586_v36, %v4345_v47  ;;  %v1601_v53 = vrot.slane %v1587_v51, %v4345_v47  ;;  %v3814_v36 = vld [vmem:[#allocation10 + $0xa4] ss:$8 sps:$4 sm:$0xff]  }
 0x4c4   :  { %v1604_v39 = vpack.c.bf16 %v1594_v38, %v1594_v38  ;;  %v1602_v41 = vcombine.high %v1594_v38, %v4160_v7  ;;  %v1606_v56 = vpack.c.bf16 %v1601_v53, %v1601_v53  ;;  %v1603_v60 = vcombine.high %v1601_v53, %v4160_v7  ;;  %v3812_v38 = vld [vmem:[#allocation10 + $0xa0] ss:$8 sps:$4 sm:$0xff]  }
 0x4c6   :  { %v1852_v42 = vsel %vm1850_vm3, %v1604_v39, 0  ;;  %v1605_v44 = vpack.c.bf16 %v1602_v41, %v1602_v41  ;;  %v1944_v59 = vsel %vm1850_vm3, %v1606_v56, 0  ;;  %v1607_v62 = vpack.c.bf16 %v1603_v60, %v1603_v60  ;;  %v3815_v41 = vld [vmem:[#allocation10 + $0x90] ss:$8 sps:$4 sm:$0xff]  }
 0x4c7   :  { %3485 = vmatpush3.bf16.msra.mxu1 %v1852_v42  ;;  %v1833_v52 = vpop.xlane.xlu0 %1832 }
 0x4c8   :  { %3490 = vmatprep.subr.bf16.mxu1 %v4160_v7  ;;  %v1898_v46 = vsel %vm1850_vm3, %v1605_v44, 0  ;;  %v1990_v1 = vsel %vm1850_vm3, %v1607_v62, 0 }
 0x4ca   :  { %3487 = vmatmul.mubr.msk.bf16.vlgmr.msra.gmra.mxu1 %vm1846_vm4, %v1842_v45 }
 0x4cb   :  { %3491 = vmatpush3.bf16.msra.mxu1 %v1898_v46  ;;  %3492 = vmatprep.mubr.msk.bf16.mxu1 %vm4161_vm0, %v4160_v7 }
 0x4cc   :  { %3496 = vmatprep.subr.bf16.mxu1 %v4160_v7 }
 0x4e4   :  { %v1827_v48 = vpop.xlane.xlu1 %1826 }
 0x4e5   :  { %3943 = vrcp.f32 %v1827_v48 }
 0x4e6   :  { %3945 = vrcp.f32 %v1830_v50 }
 0x4e7   :  { %3947 = vrcp.f32 %v1833_v52 }
 0x4f2   :  { %v3944_v54 = vpop.eup %3943 }
 0x4f3   :  { %v1839_v55 = vmul.f32 %v3944_v54, %v3940_v9  ;;  %v3946_v58 = vpop.eup %3945  ;;  %v3796_v9 = vld [vmem:[#allocation10 + $0x4] ss:$8 sps:$4 sm:$0xff]  }
 0x4f4   :  { %v1840_v61 = vmul.f32 %v3946_v58, %v4398_v11  ;;  %v3948_v0 = vpop.eup %3947  ;;  %v3784_v11 = vld [vmem:[#allocation10 + $0x44] ss:$8 sps:$4 sm:$0xff]  }
 0x4f5   :  { %v1843_v57 = vpack.c.bf16 %v1839_v55, %v1839_v55  ;;  %v1841_v2 = vmul.f32 %v3948_v0, %v4404_v14  ;;  %2311 = vmatprep.subr.bf16.mxu0 %v3784_v11  ;;  %v3785_v14 = vld [vmem:[#allocation10 + $0x30] ss:$8 sps:$4 sm:$0xff]   ;;  %v3820_v0 = vld [vmem:[#allocation10 + $0x84] ss:$8 sps:$4 sm:$0xff]  }
 0x4f6   :  { %v1844_v63 = vpack.c.bf16 %v1840_v61, %v1840_v61  ;;  %2312 = vmatpush1.bf16.msra.mxu0 %v3782_v12 }
 0x4f7   :  { %3493 = vmatmul.mubr.msk.bf16.vlgmr.msra.gmra.mxu1 %vm1846_vm4, %v1843_v57  ;;  %v1845_v3 = vpack.c.bf16 %v1841_v2, %v1841_v2  ;;  %2313 = vmatprep.subr.bf16.mxu0 %v3787_v13 }
 0x4f8   :  { %3497 = vmatpush3.bf16.msra.mxu1 %v1944_v59  ;;  %3498 = vmatprep.mubr.msk.bf16.mxu1 %vm4161_vm0, %v4160_v7 }
 0x4f9   :  { %3502 = vmatprep.subr.bf16.mxu1 %v4160_v7 }
 0x4fa   :  { %2314 = vmatpush1.bf16.msra.mxu0 %v3785_v14 }
 0x4fb   :  { %2315 = vmatprep.subr.bf16.mxu0 %v3790_v15 }
 0x4fe   :  { %2316 = vmatpush1.bf16.msra.mxu0 %v3788_v43 }
 0x4ff   :  { %3499 = vmatmul.mubr.msk.bf16.vlgmr.msra.gmra.mxu1 %vm1846_vm4, %v1844_v63  ;;  %2317 = vmatprep.subr.bf16.mxu0 %v3793_v16 }
 0x500   :  { %3503 = vmatpush3.bf16.msra.mxu1 %v1990_v1  ;;  %3504 = vmatprep.mubr.msk.bf16.mxu1 %vm4161_vm0, %v4160_v7  ;;  %v3818_v1 = vld [vmem:[#allocation10 + $0x80] ss:$8 sps:$4 sm:$0xff]  }
 0x502   :  { %2318 = vmatpush1.bf16.msra.mxu0 %v3791_v17 }
 0x503   :  { %2319 = vmatprep.subr.bf16.mxu0 %v3796_v9 }
 0x506   :  { %2320 = vmatpush1.bf16.msra.mxu0 %v3794_v18 }
 0x507   :  { %3505 = vmatmul.mubr.msk.bf16.vlgmr.msra.gmra.mxu1 %vm1846_vm4, %v1845_v3  ;;  %2321 = vmatprep.subr.bf16.mxu0 %v3799_v34 }
 0x50a   :  { %2322 = vmatpush2.bf16.msra.mxu0 %v3797_v20 }
 0x50b   :  { %2323 = vmatprep.subr.bf16.mxu0 %v3802_v22 }
 0x50e   :  { %2324 = vmatpush2.bf16.msra.mxu0 %v3800_v23 }
 0x50f   :  { %2325 = vmatprep.subr.bf16.mxu0 %v3805_v24 }
 0x512   :  { %2326 = vmatpush2.bf16.msra.mxu0 %v3803_v25 }
 0x513   :  { %2327 = vmatprep.subr.bf16.mxu0 %v3808_v26 }
 0x516   :  { %2328 = vmatpush2.bf16.msra.mxu0 %v3806_v27 }
 0x517   :  { %2329 = vmatprep.subr.bf16.mxu0 %v3811_v28 }
 0x51a   :  { %2330 = vmatpush2.bf16.msra.mxu0 %v3809_v31  ;;  %v3823_v31 = vld [vmem:[#allocation11 + $0x74] ss:$8 sps:$4 sm:$0xff]  }
 0x51b   :  { %2331 = vmatprep.subr.bf16.mxu0 %v3814_v36  ;;  %2604 = vmatprep.subr.bf16.mxu1 %v3823_v31  ;;  %v3824_v36 = vld [vmem:[#allocation11 + $0x60] ss:$8 sps:$4 sm:$0xff]   ;;  %v3904_v31 = vld [vmem:[#allocation13 + $0xc4] ss:$8 sps:$4 sm:$0xff]  }
 0x51e   :  { %2332 = vmatpush2.bf16.msra.mxu0 %v3812_v38  ;;  %v3832_v38 = vld [vmem:[#allocation11 + $0x44] ss:$8 sps:$4 sm:$0xff]  }
 0x51f   :  { %2333 = vmatprep.subr.bf16.mxu0 %v3817_v40  ;;  %v3833_v40 = vld [vmem:[#allocation11 + $0x30] ss:$8 sps:$4 sm:$0xff]  }
 0x522   :  { %2334 = vmatpush2.bf16.msra.mxu0 %v3815_v41  ;;  %v3838_v41 = vld [vmem:[#allocation11 + $0x24] ss:$8 sps:$4 sm:$0xff]  }
 0x523   :  { %2335 = vmatprep.subr.bf16.mxu0 %v3820_v0  ;;  %v3851_v0 = vld [vmem:[#allocation11 + $0xd0] ss:$8 sps:$4 sm:$0xff]  }
 0x526   :  { %2336 = vmatpush2.bf16.msra.mxu0 %v3818_v1  ;;  %v3856_v1 = vld [vmem:[#allocation11 + $0xc4] ss:$8 sps:$4 sm:$0xff]  }
 0x58a   :  { %v1888_v29 = vpop.f32.mrf.mxu1 }
 0x58c   :  { %v3488_v35 = vpop.f32.mrf.mxu1 }
 0x58d   :  { %v3826_v35 = vld [vmem:[#allocation11 + $0x64] ss:$8 sps:$4 sm:$0xff]  }
 0x58e   :  { %v1891_v37 = vpop.f32.mrf.mxu1 }
 0x58f   :  { %v3827_v37 = vld [vmem:[#allocation11 + $0x50] ss:$8 sps:$4 sm:$0xff]  }
 0x590   :  { %v3489_v39 = vpop.f32.mrf.mxu1 }
 0x591   :  { %v3835_v39 = vld [vmem:[#allocation11 + $0x34] ss:$8 sps:$4 sm:$0xff]  }
 0x5b7   :  { %v1934_v42 = vpop.f32.mrf.mxu1 }
 0x5b9   :  { %v3494_v44 = vpop.f32.mrf.mxu1 }
 0x5ba   :  { %v3841_v44 = vld [vmem:[#allocation11 + $0x14] ss:$8 sps:$4 sm:$0xff]  }
 0x5bb   :  { %v1937_v45 = vpop.f32.mrf.mxu1 }
 0x5bc   :  { %v3839_v45 = vld [vmem:[#allocation11 + $0x10] ss:$8 sps:$4 sm:$0xff]  }
 0x5bd   :  { %v3495_v46 = vpop.f32.mrf.mxu1 }
 0x5be   :  { %v3844_v46 = vld [vmem:[#allocation11 + $0x4] ss:$8 sps:$4 sm:$0xff]  }
 0x5bf   :  { %v1980_v48 = vpop.f32.mrf.mxu1 }
 0x5c0   :  { %v2032_v53 = vcombine.low %v1888_v29, %v1980_v48  ;;  %v3821_v29 = vld [vmem:[#allocation11 + $0x70] ss:$8 sps:$4 sm:$0xff]   ;;  %v3842_v48 = vld [vmem:[#allocation11] ss:$8 sps:$4 sm:$0xff]  }
 0x5c1   :  { %v3500_v50 = vpop.f32.mrf.mxu1  ;;  %2605 = vmatpush1.bf16.msra.mxu1 %v3821_v29  ;;  %v3899_v29 = vld [vmem:[#allocation13 + $0xd0] ss:$8 sps:$4 sm:$0xff]  }
 0x5c2   :  { %v2039_v57 = vrot.slane %v2032_v53, %v4295_v49  ;;  %2606 = vmatprep.subr.bf16.mxu1 %v3826_v35  ;;  %v3847_v50 = vld [vmem:[#allocation11 + $0xf4] ss:$8 sps:$4 sm:$0xff]   ;;  %v3848_v53 = vld [vmem:[#allocation11 + $0xe0] ss:$8 sps:$4 sm:$0xff]  }
 0x5c3   :  { %v1983_v51 = vpop.f32.mrf.mxu1  ;;  %v3902_v35 = vld [vmem:[#allocation13 + $0xc0] ss:$8 sps:$4 sm:$0xff]  }
 0x5c4   :  { %v3845_v51 = vld [vmem:[#allocation11 + $0xf0] ss:$8 sps:$4 sm:$0xff]  }
 0x5c5   :  { %v3501_v52 = vpop.f32.mrf.mxu1  ;;  %2607 = vmatpush1.bf16.msra.mxu1 %v3824_v36  ;;  %v3907_v36 = vld [vmem:[#allocation13 + $0xb4] ss:$8 sps:$4 sm:$0xff]  }
 0x5c6   :  { %v3850_v52 = vld [vmem:[#allocation11 + $0xe4] ss:$8 sps:$4 sm:$0xff]  }
 0x5c7   :  { %v2026_v54 = vpop.f32.mrf.mxu1 }
 0x5c8   :  { %v2040_v55 = vcombine.low %v1934_v42, %v2026_v54  ;;  %v3836_v42 = vld [vmem:[#allocation11 + $0x20] ss:$8 sps:$4 sm:$0xff]  }
 0x5c9   :  { %v3506_v56 = vpop.f32.mrf.mxu1 }
 0x5ca   :  { %v2047_v58 = vrot.slane %v2040_v55, %v4295_v49 }
 0x5cb   :  { %v2029_v59 = vpop.f32.mrf.mxu1 }
 0x5cc   :  { %v2048_v60 = vcombine.low %v2039_v57, %v2047_v58 }
 0x5cd   :  { %v3507_v61 = vpop.f32.mrf.mxu1 }
 0x5ce   :  { %v2055_v62 = vrot.slane %v2048_v60, %v4345_v47 }
 0x5d0   :  { %v2063_v63 = vcombine.high %v2055_v62, %v4160_v7  ;;  %v2062_v2 = vrot.slane %v2055_v62, %v4295_v49 }
 0x5d2   :  { %v2070_v3 = vrot.slane %v2063_v63, %v4295_v49  ;;  %v3853_v63 = vld [vmem:[#allocation11 + $0xd4] ss:$8 sps:$4 sm:$0xff]  }
 0x5d4   :  { %v2071_v4 = vcombine.low %v2062_v2, %v2070_v3  ;;  %v2072_v5 = vcombine.high %v2062_v2, %v2070_v3  ;;  %v3854_v2 = vld [vmem:[#allocation11 + $0xc0] ss:$8 sps:$4 sm:$0xff]   ;;  %v3859_v3 = vld [vmem:[#allocation11 + $0xb4] ss:$8 sps:$4 sm:$0xff]  }
 0x5d6   :  { %v2079_v6 = vrot.slane %v2071_v4, %v4345_v47  ;;  %v2086_v8 = vrot.slane %v2072_v5, %v4345_v47  ;;  %v2133_v47 = vld [vmem:[%s4518_s6] sm:$0x3]  ;;  %v3857_v4 = vld [vmem:[#allocation11 + $0xb0] ss:$8 sps:$4 sm:$0xff]   ;;  %v3862_v5 = vld [vmem:[#allocation11 + $0xa4] ss:$8 sps:$4 sm:$0xff]  }
 0x5d7   :  { %v2142_v17 = vrot.slane %v2133_v47, %v4303_v21 }
 0x5d8   :  { %v2087_v10 = vcombine.high %v2079_v6, %v4160_v7  ;;  %v2088_v32 = vcombine.high %v2086_v8, %v4160_v7  ;;  %v2138_v7 = vrot.slane %v2133_v47, %v4300_v19  ;;  %v3878_v47 = vld [vmem:[#allocation13 + $0x40] ss:$8 sps:$4 sm:$0xff]  }
 0x5da   :  { %v3527_v11 = vpack.i.bf16 %v2087_v10, %v2088_v32  ;;  %v3863_v10 = vld [vmem:[#allocation11 + $0x90] ss:$8 sps:$4 sm:$0xff]   ;;  %v3868_v32 = vld [vmem:[#allocation11 + $0x84] ss:$8 sps:$4 sm:$0xff]  }
 0x5dc   :  { %3528 = vrot.lane.b32.xlu1 %v3527_v11, %s4157_s22  ;;  %v3866_v11 = vld [vmem:[#allocation11 + $0x80] ss:$8 sps:$4 sm:$0xff]  }
 0x64e   :  { %v3529_v12 = vpop.permute.xlu1 %3528 }
 0x64f   :  { %v3531_v13 = vunpack.i.h.bf16 %v3529_v12  ;;  %v3530_v14 = vunpack.i.l.bf16 %v3529_v12  ;;  %v3869_v12 = vld [vmem:[#allocation13 + $0x70] ss:$8 sps:$4 sm:$0xff]  }
 0x651   :  { %v2097_v49 = vsel %vm1608_vm1, %v2079_v6, %v3531_v13  ;;  %v2098_v15 = vsel %vm1608_vm1, %v2086_v8, %v3530_v14  ;;  %v3860_v6 = vld [vmem:[#allocation11 + $0xa0] ss:$8 sps:$4 sm:$0xff]   ;;  %v3865_v8 = vld [vmem:[#allocation11 + $0x94] ss:$8 sps:$4 sm:$0xff]   ;;  %v3874_v14 = vld [vmem:[#allocation13 + $0x64] ss:$8 sps:$4 sm:$0xff]  }
 0x652   :  { %v2099_v43 = vpack.c.bf16 %v2097_v49, %v2097_v49  ;;  %v2100_v16 = vpack.c.bf16 %v2098_v15, %v2098_v15  ;;  %v3871_v13 = vld [vmem:[#allocation13 + $0x74] ss:$8 sps:$4 sm:$0xff]   ;;  %v3872_v49 = vld [vmem:[#allocation13 + $0x60] ss:$8 sps:$4 sm:$0xff]  }
 0x653   :  { %2853 = vmatprep.subr.bf16.mxu0 %v3871_v13  ;;  %v3877_v15 = vld [vmem:[#allocation13 + $0x54] ss:$8 sps:$4 sm:$0xff]  }
 0x654   :  { %2337 = vmatprep.mubr.bf16.mxu0 %v2100_v16  ;;  %v3880_v16 = vld [vmem:[#allocation13 + $0x44] ss:$8 sps:$4 sm:$0xff]   ;;  %v2681_v13 = vld [vmem:[%s4524_s12] sm:$0x3] }
 0x655   :  { %2338 = vmatmul.mubr.bf16.vlgmr.msra.gmra.mxu0 %v2099_v43  ;;  %v3875_v43 = vld [vmem:[#allocation13 + $0x50] ss:$8 sps:$4 sm:$0xff]  }
 0x656   :  { %2854 = vmatpush1.bf16.msra.mxu0 %v3869_v12 }
 0x657   :  { %2855 = vmatprep.subr.bf16.mxu0 %v3874_v14  ;;  %v2686_v14 = vrot.slane %v2681_v13, %v4300_v19 }
 0x65a   :  { %2856 = vmatpush1.bf16.msra.mxu0 %v3872_v49  ;;  %v2690_v49 = vrot.slane %v2681_v13, %v4303_v21 }
 0x65b   :  { %2857 = vmatprep.subr.bf16.mxu0 %v3877_v15 }
 0x65e   :  { %2858 = vmatpush1.bf16.msra.mxu0 %v3875_v43 }
 0x65f   :  { %2859 = vmatprep.subr.bf16.mxu0 %v3880_v16 }
 0x662   :  { %2860 = vmatpush1.bf16.msra.mxu0 %v3878_v47 }
 0x715   :  { %v2339_v9 = vpop.f32.mrf.mxu0 }
 0x716   :  { %v2340_v18 = vadd.f32 %v2339_v9, %v2138_v7  ;;  %v3883_v7 = vld [vmem:[#allocation13 + $0x34] ss:$8 sps:$4 sm:$0xff]   ;;  %v3886_v9 = vld [vmem:[#allocation13 + $0x24] ss:$8 sps:$4 sm:$0xff]  }
 0x717   :  { %v2341_v34 = vpop.f32.mrf.mxu0  ;;  %2861 = vmatprep.subr.bf16.mxu0 %v3883_v7 }
 0x718   :  { %v2346_v20 = vadd.f32 %v2340_v18, %v4307_v30  ;;  %v2342_v22 = vadd.f32 %v2341_v34, %v2142_v17  ;;  %v3829_v30 = vld [vmem:[#allocation11 + $0x54] ss:$8 sps:$4 sm:$0xff]   ;;  %v3881_v17 = vld [vmem:[#allocation13 + $0x30] ss:$8 sps:$4 sm:$0xff]   ;;  %v3884_v18 = vld [vmem:[#allocation13 + $0x20] ss:$8 sps:$4 sm:$0xff]  }
 0x719   :  { %v2343_v23 = vpop.f32.mrf.mxu0  ;;  %2608 = vmatprep.subr.bf16.mxu1 %v3829_v30  ;;  %2862 = vmatpush1.bf16.msra.mxu0 %v3881_v17  ;;  %v3889_v34 = vld [vmem:[#allocation13 + $0x14] ss:$8 sps:$4 sm:$0xff]   ;;  %v3905_v30 = vld [vmem:[#allocation13 + $0xb0] ss:$8 sps:$4 sm:$0xff]  }
 0x71a   :  { %v2347_v24 = vadd.f32 %v2342_v22, %v4309_v33  ;;  %v2349_v26 = vsel %vm2348_vm5, %v2346_v20, 0.0  ;;  %2609 = vmatpush1.bf16.msra.mxu1 %v3827_v37  ;;  %v3830_v33 = vld [vmem:[#allocation11 + $0x40] ss:$8 sps:$4 sm:$0xff]   ;;  %2863 = vmatprep.subr.bf16.mxu0 %v3886_v9  ;;  %v3892_v22 = vld [vmem:[#allocation13 + $0x4] ss:$8 sps:$4 sm:$0xff]  }
 0x71b   :  { %v2344_v25 = vpop.f32.mrf.mxu0  ;;  %2610 = vmatprep.subr.bf16.mxu1 %v3832_v38  ;;  %v3890_v23 = vld [vmem:[#allocation13] ss:$8 sps:$4 sm:$0xff]   ;;  %v3910_v37 = vld [vmem:[#allocation13 + $0xa4] ss:$8 sps:$4 sm:$0xff]  }
 0x71c   :  { %v2350_v27 = vsel %vm2348_vm5, %v2347_v24, 0.0  ;;  %v3893_v25 = vld [vmem:[#allocation13 + $0xf0] ss:$8 sps:$4 sm:$0xff]   ;;  %v3908_v38 = vld [vmem:[#allocation13 + $0xa0] ss:$8 sps:$4 sm:$0xff]  }
 0x71d   :  { %v2351_v28 = vadd.f32 %v2350_v27, %v2349_v26  ;;  %2864 = vmatpush1.bf16.msra.mxu0 %v3884_v18  ;;  %v3898_v26 = vld [vmem:[#allocation13 + $0xe4] ss:$8 sps:$4 sm:$0xff]   ;;  %v3896_v27 = vld [vmem:[#allocation13 + $0xe0] ss:$8 sps:$4 sm:$0xff]  }
 0x71e   :  { %2611 = vmatpush1.bf16.msra.mxu1 %v3830_v33  ;;  %2865 = vmatprep.subr.bf16.mxu0 %v3889_v34 }
 0x71f   :  { %2352 = vadd.xlane.f32.xlu0 %v2351_v28  ;;  %2612 = vmatprep.subr.bf16.mxu1 %v3835_v39  ;;  %v3901_v28 = vld [vmem:[#allocation13 + $0xd4] ss:$8 sps:$4 sm:$0xff]  }
 0x722   :  { %2613 = vmatpush1.bf16.msra.mxu1 %v3833_v40 }
 0x723   :  { %2614 = vmatprep.subr.bf16.mxu1 %v3838_v41  ;;  %v2370_v41 = vld [vmem:[%s4519_s7] sm:$0x3] }
 0x726   :  { %2615 = vmatpush1.bf16.msra.mxu1 %v3836_v42  ;;  %v2384_v42 = vld [vmem:[%s4520_s8] sm:$0x3] }
 0x727   :  { %2616 = vmatprep.subr.bf16.mxu1 %v3841_v44  ;;  %v2375_v44 = vrot.slane %v2370_v41, %v4300_v19 }
 0x72a   :  { %2617 = vmatpush1.bf16.msra.mxu1 %v3839_v45  ;;  %v2379_v45 = vrot.slane %v2370_v41, %v4303_v21  ;;  %v3924_v41 = vld [vmem:[#allocation14 + $0x20] sm:$0xff]  }
 0x72b   :  { %2618 = vmatprep.subr.bf16.mxu1 %v3844_v46 }
 0x72e   :  { %2619 = vmatpush1.bf16.msra.mxu1 %v3842_v48 }
 0x72f   :  { %2620 = vmatprep.subr.bf16.mxu1 %v3847_v50  ;;  %v2389_v50 = vrot.slane %v2384_v42, %v4300_v19 }
 0x732   :  { %2621 = vmatpush2.bf16.msra.mxu1 %v3845_v51  ;;  %v2393_v51 = vrot.slane %v2384_v42, %v4303_v21  ;;  %v3925_v42 = vld [vmem:[#allocation14 + $0x58] sm:$0xff]  }
 0x733   :  { %2622 = vmatprep.subr.bf16.mxu1 %v3850_v52 }
 0x736   :  { %2623 = vmatpush2.bf16.msra.mxu1 %v3848_v53 }
 0x737   :  { %2624 = vmatprep.subr.bf16.mxu1 %v3853_v63  ;;  %v3916_v63 = vld [vmem:[#allocation13 + $0x84] ss:$8 sps:$4 sm:$0xff]  }
 0x73a   :  { %2625 = vmatpush2.bf16.msra.mxu1 %v3851_v0 }
 0x73b   :  { %2626 = vmatprep.subr.bf16.mxu1 %v3856_v1 }
 0x73e   :  { %2627 = vmatpush2.bf16.msra.mxu1 %v3854_v2 }
 0x73f   :  { %2628 = vmatprep.subr.bf16.mxu1 %v3859_v3 }
 0x742   :  { %2629 = vmatpush2.bf16.msra.mxu1 %v3857_v4 }
 0x743   :  { %2630 = vmatprep.subr.bf16.mxu1 %v3862_v5 }
 0x746   :  { %2631 = vmatpush2.bf16.msra.mxu1 %v3860_v6 }
 0x747   :  { %2632 = vmatprep.subr.bf16.mxu1 %v3865_v8 }
 0x74a   :  { %2633 = vmatpush2.bf16.msra.mxu1 %v3863_v10 }
 0x74b   :  { %2634 = vmatprep.subr.bf16.mxu1 %v3868_v32 }
 0x74e   :  { %2635 = vmatpush2.bf16.msra.mxu1 %v3866_v11 }
 0x7a8   :  { %v2353_v54 = vpop.xlane.xlu0 %2352 }
 0x7a9   :  { %v2355_v55 = vmul.f32 0.00390625, %v2353_v54 }
 0x7ab   :  { %v4460_v56 = vsub.f32 %v2346_v20, %v2355_v55  ;;  %v4462_v57 = vsub.f32 %v2347_v24, %v2355_v55  ;;  %v3887_v20 = vld [vmem:[#allocation13 + $0x10] ss:$8 sps:$4 sm:$0xff]   ;;  %v3895_v24 = vld [vmem:[#allocation13 + $0xf4] ss:$8 sps:$4 sm:$0xff]  }
 0x7ac   :  { %2866 = vmatpush1.bf16.msra.mxu0 %v3887_v20 }
 0x7ad   :  { %v2358_v58 = vmul.f32 %v4460_v56, %v4460_v56  ;;  %v2359_v59 = vmul.f32 %v4462_v57, %v4462_v57  ;;  %2867 = vmatprep.subr.bf16.mxu0 %v3892_v22 }
 0x7af   :  { %v2360_v60 = vsel %vm2348_vm5, %v2358_v58, 0.0  ;;  %v2361_v61 = vsel %vm2348_vm5, %v2359_v59, 0.0 }
 0x7b0   :  { %v2362_v62 = vadd.f32 %v2361_v61, %v2360_v60  ;;  %2868 = vmatpush1.bf16.msra.mxu0 %v3890_v23  ;;  %v3913_v61 = vld [vmem:[#allocation13 + $0x94] ss:$8 sps:$4 sm:$0xff]  }
 0x7b1   :  { %2869 = vmatprep.subr.bf16.mxu0 %v3895_v24  ;;  %v3917_v23 = vld [vmem:[#allocation14 + $0x78] sm:$0xff]  }
 0x7b2   :  { %2363 = vadd.xlane.f32.xlu0 %v2362_v62  ;;  %v3911_v62 = vld [vmem:[#allocation13 + $0x90] ss:$8 sps:$4 sm:$0xff]   ;;  %3438 = vmatprep.subr.bf16.mxu1 %v3917_v23 }
 0x7b3   :  { %v3918_v24 = vld [vmem:[#allocation14 + $0x38] sm:$0xff]  }
 0x7b4   :  { %2870 = vmatpush2.bf16.msra.mxu0 %v3893_v25  ;;  %v3919_v25 = vld [vmem:[#allocation14 + $0x70] sm:$0xff]  }
 0x7b5   :  { %2871 = vmatprep.subr.bf16.mxu0 %v3898_v26 }
 0x7b8   :  { %2872 = vmatpush2.bf16.msra.mxu0 %v3896_v27 }
 0x7b9   :  { %2873 = vmatprep.subr.bf16.mxu0 %v3901_v28 }
 0x7bc   :  { %2874 = vmatpush2.bf16.msra.mxu0 %v3899_v29 }
 0x7bd   :  { %2875 = vmatprep.subr.bf16.mxu0 %v3904_v31 }
 0x7c0   :  { %2876 = vmatpush2.bf16.msra.mxu0 %v3902_v35 }
 0x7c1   :  { %2877 = vmatprep.subr.bf16.mxu0 %v3907_v36 }
 0x7c4   :  { %2878 = vmatpush2.bf16.msra.mxu0 %v3905_v30 }
 0x7c5   :  { %2879 = vmatprep.subr.bf16.mxu0 %v3910_v37 }
 0x7c8   :  { %2880 = vmatpush2.bf16.msra.mxu0 %v3908_v38  ;;  %v3920_v38 = vld [vmem:[#allocation14 + $0x30] sm:$0xff]  }
 0x7c9   :  { %2881 = vmatprep.subr.bf16.mxu0 %v3913_v61 }
 0x7cc   :  { %2882 = vmatpush2.bf16.msra.mxu0 %v3911_v62 }
 0x7cd   :  { %2883 = vmatprep.subr.bf16.mxu0 %v3916_v63 }
 0x83b   :  { %v2364_v33 = vpop.xlane.xlu0 %2363 }
 0x83c   :  { %v2365_v39 = vmul.f32 0.00390625, %v2364_v33  ;;  %v3921_v33 = vld [vmem:[#allocation14 + $0x68] sm:$0xff]  }
 0x83e   :  { %v2366_v40 = vadd.f32 1e-05, %v2365_v39  ;;  %v3922_v39 = vld [vmem:[#allocation14 + $0x28] sm:$0xff]  }
 0x840   :  { %3949 = vrsqrt.f32 %v2366_v40  ;;  %v3923_v40 = vld [vmem:[#allocation14 + $0x60] sm:$0xff]  }
 0x84d   :  { %v3950_v46 = vpop.eup %3949 }
 0x84e   :  { %v2369_v48 = vmul.f32 %v3950_v46, %v4462_v57  ;;  %v2368_v52 = vmul.f32 %v3950_v46, %v4460_v56  ;;  %v3914_v57 = vld [vmem:[#allocation13 + $0x80] ss:$8 sps:$4 sm:$0xff]   ;;  %v2432_v56 = vld [vmem:[%s4522_s10] sm:$0x3] }
 0x84f   :  { %2884 = vmatpush2.bf16.msra.mxu0 %v3914_v57  ;;  %v2437_v0 = vrot.slane %v2432_v56, %v4300_v19  ;;  %v2441_v1 = vrot.slane %v2432_v56, %v4303_v21  ;;  %v3928_v46 = vld [vmem:[#allocation14 + $0x10] sm:$0xff]  }
 0x850   :  { %v2383_v53 = vmul.f32 %v2379_v45, %v2369_v48  ;;  %v2382_v54 = vmul.f32 %v2375_v44, %v2368_v52  ;;  %v3926_v44 = vld [vmem:[#allocation14 + $0x18] sm:$0xff]   ;;  %v3927_v45 = vld [vmem:[#allocation14 + $0x50] sm:$0xff]   ;;  %v3929_v48 = vld [vmem:[#allocation14 + $0x48] sm:$0xff]  }
 0x851   :  { %v3932_v52 = vld [vmem:[#allocation14] sm:$0xff]  }
 0x852   :  { %v2397_v55 = vadd.f32 %v2393_v51, %v2383_v53  ;;  %v2396_v58 = vadd.f32 %v2389_v50, %v2382_v54  ;;  %v3930_v50 = vld [vmem:[#allocation14 + $0x8] sm:$0xff]   ;;  %v3931_v51 = vld [vmem:[#allocation14 + $0x40] sm:$0xff]  }
 0x854   :  { %v2399_v59 = vpack.c.bf16 %v2397_v55, %v2397_v55  ;;  %v2398_v60 = vpack.c.bf16 %v2396_v58, %v2396_v58 }
 0x856   :  { %2636 = vmatprep.mubr.bf16.mxu1 %v2399_v59  ;;  %v2930_v59 = vld [vmem:[%s4526_s14] sm:$0x3] }
 0x857   :  { %2637 = vmatmul.mubr.bf16.vlgmr.msra.gmra.mxu1 %v2398_v60  ;;  %v2935_v57 = vrot.slane %v2930_v59, %v4300_v19  ;;  %v2939_v56 = vrot.slane %v2930_v59, %v4303_v21 }
 0x858   :  { %3439 = vmatpush3.bf16.msra.mxu1 %v3918_v24 }
 0x859   :  { %3440 = vmatprep.subr.bf16.mxu1 %v3919_v25 }
 0x85c   :  { %3441 = vmatpush3.bf16.msra.mxu1 %v3920_v38 }
 0x85d   :  { %3442 = vmatprep.subr.bf16.mxu1 %v3921_v33 }
 0x860   :  { %3443 = vmatpush3.bf16.msra.mxu1 %v3922_v39 }
 0x861   :  { %3444 = vmatprep.subr.bf16.mxu1 %v3923_v40 }
 0x864   :  { %3445 = vmatpush3.bf16.msra.mxu1 %v3924_v41 }
 0x865   :  { %3446 = vmatprep.subr.bf16.mxu1 %v3925_v42 }
 0x868   :  { %3447 = vmatpush3.bf16.msra.mxu1 %v3926_v44 }
 0x869   :  { %3448 = vmatprep.subr.bf16.mxu1 %v3927_v45 }
 0x86c   :  { %3449 = vmatpush3.bf16.msra.mxu1 %v3928_v46 }
 0x86d   :  { %3450 = vmatprep.subr.bf16.mxu1 %v3929_v48 }
 0x870   :  { %3451 = vmatpush3.bf16.msra.mxu1 %v3930_v50 }
 0x871   :  { %3452 = vmatprep.subr.bf16.mxu1 %v3931_v51 }
 0x874   :  { %3453 = vmatpush3.bf16.msra.mxu1 %v3932_v52 }
 0x917   :  { %v2638_v2 = vpop.f32.mrf.mxu1 }
 0x918   :  { %v2639_v3 = vadd.f32 %v2638_v2, %v2437_v0 }
 0x919   :  { %v2640_v4 = vpop.f32.mrf.mxu1 }
 0x91a   :  { %v2641_v5 = vadd.f32 %v2640_v4, %v2441_v1  ;;  %v2645_v6 = vmax.f32 %v2639_v3, 0.0 }
 0x91b   :  { %v2642_v8 = vpop.f32.mrf.mxu1 }
 0x91c   :  { %v2646_v10 = vmax.f32 %v2641_v5, 0.0  ;;  %v2647_v12 = vpack.c.bf16 %v2645_v6, %v2645_v6 }
 0x91d   :  { %v2643_v32 = vpop.f32.mrf.mxu1 }
 0x91e   :  { %v2648_v11 = vpack.c.bf16 %v2646_v10, %v2646_v10  ;;  %v3405_v10 = vld [vmem:[%s4528_s16] ss:$0 sm:$0xff] }
 0x920   :  { %2885 = vmatprep.mubr.bf16.mxu0 %v2648_v11 }
 0x921   :  { %2886 = vmatmul.mubr.bf16.vlgmr.msra.gmra.mxu0 %v2647_v12 }
 0x9e1   :  { %v2887_v15 = vpop.f32.mrf.mxu0 }
 0x9e2   :  { %v2888_v43 = vadd.f32 %v2887_v15, %v2686_v14 }
 0x9e3   :  { %v2889_v16 = vpop.f32.mrf.mxu0 }
 0x9e4   :  { %v2894_v47 = vadd.f32 %v2888_v43, %v2396_v58  ;;  %v2890_v7 = vadd.f32 %v2889_v16, %v2690_v49  ;;  %v2916_v58 = vld [vmem:[%s4525_s13] sm:$0x3] }
 0x9e5   :  { %v2891_v17 = vpop.f32.mrf.mxu0  ;;  %v2921_v60 = vrot.slane %v2916_v58, %v4300_v19  ;;  %v2925_v61 = vrot.slane %v2916_v58, %v4303_v21 }
 0x9e6   :  { %v2895_v9 = vadd.f32 %v2890_v7, %v2397_v55  ;;  %v2896_v34 = vsel %vm2348_vm5, %v2894_v47, 0.0 }
 0x9e7   :  { %v2892_v18 = vpop.f32.mrf.mxu0 }
 0x9e8   :  { %v2897_v20 = vsel %vm2348_vm5, %v2895_v9, 0.0 }
 0x9e9   :  { %v2898_v22 = vadd.f32 %v2897_v20, %v2896_v34 }
 0x9eb   :  { %2899 = vadd.xlane.f32.xlu0 %v2898_v22 }
 0xa74   :  { %v2900_v26 = vpop.xlane.xlu0 %2899 }
 0xa75   :  { %v2901_v27 = vmul.f32 0.00390625, %v2900_v26 }
 0xa77   :  { %v2902_v28 = vsub.f32 %v2894_v47, %v2901_v27  ;;  %v2903_v29 = vsub.f32 %v2895_v9, %v2901_v27 }
 0xa79   :  { %v2904_v31 = vmul.f32 %v2902_v28, %v2902_v28  ;;  %v2905_v35 = vmul.f32 %v2903_v29, %v2903_v29 }
 0xa7b   :  { %v2906_v36 = vsel %vm2348_vm5, %v2904_v31, 0.0  ;;  %v2907_v30 = vsel %vm2348_vm5, %v2905_v35, 0.0 }
 0xa7c   :  { %v2908_v37 = vadd.f32 %v2907_v30, %v2906_v36 }
 0xa7e   :  { %2909 = vadd.xlane.f32.xlu0 %v2908_v37 }
 0xb07   :  { %v2910_v53 = vpop.xlane.xlu0 %2909 }
 0xb08   :  { %v2911_v54 = vmul.f32 0.00390625, %v2910_v53 }
 0xb0a   :  { %v2912_v55 = vadd.f32 1e-05, %v2911_v54 }
 0xb0c   :  { %3951 = vrsqrt.f32 %v2912_v55 }
 0xb19   :  { %v3952_v62 = vpop.eup %3951 }
 0xb1a   :  { %v2915_v63 = vmul.f32 %v3952_v62, %v2903_v29  ;;  %v2914_v0 = vmul.f32 %v3952_v62, %v2902_v28 }
 0xb1c   :  { %v2929_v1 = vmul.f32 %v2925_v61, %v2915_v63  ;;  %v2928_v2 = vmul.f32 %v2921_v60, %v2914_v0 }
 0xb1e   :  { %v2943_v3 = vadd.f32 %v2939_v56, %v2929_v1  ;;  %v2942_v4 = vadd.f32 %v2935_v57, %v2928_v2 }
 0xb20   :  { %v2945_v5 = vpack.c.bf16 %v2943_v3, %v2943_v3  ;;  %v2944_v6 = vpack.c.bf16 %v2942_v4, %v2942_v4 }
 0xb22   :  { %3113 = vmatprep.mubr.bf16.mxu1 %v2945_v5 }
 0xb23   :  { %3114 = vmatmul.mubr.bf16.vlgmr.msra.gmra.mxu1 %v2944_v6 }
 0xbe3   :  { %v3454_v8 = vpop.f32.mrf.mxu1 }
 0xbe5   :  { %v3455_v32 = vpop.f32.mrf.mxu1 }
 0xbe6   :  { %v3456_v19 = vadd.f32 %v3455_v32, %v3454_v8 }
 0xbe7   :  { %v3457_v11 = vpop.f32.mrf.mxu1 }
 0xbe8   :  { %v3116_v21 = vadd.f32 %v3456_v19, %v3405_v10 }
 0xbe9   :  { %v3458_v12 = vpop.f32.mrf.mxu1 }
 0xbea   :  { %3121 = vst [vmem:[#allocation16] sm:$0x3] %v3116_v21 }
 0xbeb   :  { %4124 = shalt.err (!%p4121_p2)
}
 0xbec   :  { %3131 = dma.vmem_to_hbm [thread:$0]  %s3129_s19, 32, %s4529_s17, [#allocation4]  }
 0xbed   :  { %4143 = dma.done.wait [#allocation4], 32  }
 0xbee   :  { %4144 = vsyncadd [#allocation4], 4294967264 }
 0xbef   :  { %3135 = vsyncpa [#allocation3], 1 }
 0xbf0   :  { %3136 = vsyncpa [#allocation6], 1 }
 0xbf1   :  { %3137 = vsyncpa [#allocation9], 1 }
 0xbf2   :  { %3138 = vsyncpa [#allocation12], 1 }
 0xbf3   :  { %3139 = vsyncpa [#allocation15], 1 }
 0xbf4   :  { %3140 = vsyncpa [#allocation4], 1 }

</bundles_post_ra>
